<compile_context>
chip_gen: v6e
topology: v6e:2x2x1
jax: 0.10.0
libtpu: 0.0.40
codegen_flags: <defaults>
</compile_context>

<pallas_src>
import functools

import jax
import jax.numpy as jnp
from jax.experimental import pallas as pl
from jax.experimental.pallas import tpu as pltpu

BN_EPS = 1e-5


def _round_up(a, b):
    return -(-a // b) * b


def _physical_vmem_bytes():
    """Best-effort per-core physical VMEM query; conservative (v7x) fallback."""
    try:
        info = pltpu.get_tpu_info()
        for name in ("vmem_capacity_bytes", "vmem_bytes", "vmem_size_bytes"):
            v = getattr(info, name, None)
            if v:
                return int(v)
    except Exception:
        pass
    return 64 * 1024 * 1024  # v7x-sized fallback: safe on every generation


def _choose_tile(M, K, N):
    """Largest M-tile (multiple of 8) whose working set fits the VMEM budget."""
    phys = _physical_vmem_bytes()
    vmem_limit = int(phys * 0.70)   # raise the conservative scoped default
    budget = int(phys * 0.45)       # target for the double-buffered working set
    # Per M-row bytes: 2x bf16 input buffers, 2x f32 output buffers,
    # f32 h (+ one elementwise temp), bf16 relu'd copy feeding the MXU.
    per_row = 2 * K * 2 + 2 * N * 4 + 2 * N * 4 + K * 2
    # Grid-invariant residents: double-buffered bf16 weight + small (1, N) vectors.
    fixed = 2 * K * N * 2 + 8 * N * 4
    cap = max(8, (budget - fixed) // per_row)
    if cap >= M:
        TM = _round_up(M, 8)                      # single tile
    elif cap >= 256:
        TM = (cap // 256) * 256                   # big tiles amortize ~0.35us/step
    else:
        TM = max(8, (cap // 8) * 8)
    M_pad = _round_up(M, TM)
    return TM, M_pad, vmem_limit


def _stats_kernel(x_ref, w_ref, psum_ref, pssq_ref):
    # x_ref: (TM, K) bf16 im2col'd tile; w_ref: (K, N) bf16 conv weight matrix.
    # psum_ref / pssq_ref: (1, 8, N) f32 per-tile partial sums (rows replicated).
    xi = jnp.maximum(x_ref[...], 0)                                     # ReLU (VPU)
    h = jnp.dot(xi, w_ref[...], preferred_element_type=jnp.float32)    # (TM, N) f32
    s = jnp.sum(h, axis=0, keepdims=True)                               # (1, N)
    ss = jnp.sum(h * h, axis=0, keepdims=True)
    psum_ref[...] = jnp.broadcast_to(s.reshape(1, 1, -1), psum_ref.shape)
    pssq_ref[...] = jnp.broadcast_to(ss.reshape(1, 1, -1), pssq_ref.shape)


def _norm_kernel(x_ref, w_ref, scale_ref, shift_ref, o_ref):
    # Recompute h (cheaper than a writeback+re-read when 2*K < 8*N) and apply
    # the precomputed per-channel BN affine:  out = h * scale + shift.
    xi = jnp.maximum(x_ref[...], 0)
    h = jnp.dot(xi, w_ref[...], preferred_element_type=jnp.float32)
    o_ref[...] = h * scale_ref[...] + shift_ref[...]


@functools.partial(jax.jit, static_argnames=("stride", "padding"))
def relu_conv_bn_forward(x_nchw, conv_w, gamma, beta, *, stride=1, padding=0):
    """ReLU -> Conv2d(C_in, C_out, k, stride, padding, bias=False) -> BatchNorm2d.

    x_nchw: (B, C_in, H, W) f32 (PyTorch layout). Returns (B, C_out, Ho, Wo) f32.
    """
    B, C_in, H, W = x_nchw.shape
    C_out, C_in_w, kh, kw = conv_w.shape
    assert C_in_w == C_in and kh == kw, "square kernels, matching channels"
    k = kh
    Ho = (H + 2 * padding - k) // stride + 1
    Wo = (W + 2 * padding - k) // stride + 1
    HW = Ho * Wo
    K = k * k * C_in
    M = B * HW

    # ---- wrapper-side layout plumbing (fused by XLA under jit) ----
    # im2col; ReLU commutes with patch extraction / zero padding (relu(0)=0) and
    # with the bf16 cast, so both stay inside the kernel / before the matmul.
    # TODO(synk): for k>1 this materializes a k^2-inflated copy of the input in
    # HBM; an in-kernel im2col (k^2 shifted accumulating matmuls) would avoid it.
    xp = jnp.pad(x_nchw, ((0, 0), (0, 0), (padding, padding), (padding, padding)))
    cols = []
    for di in range(k):
        for dj in range(k):
            cols.append(xp[:, :, di:di + stride * (Ho - 1) + 1:stride,
                                 dj:dj + stride * (Wo - 1) + 1:stride])
    xcol = jnp.stack(cols, axis=1)                                  # (B,kk,C_in,Ho,Wo)
    xcol = jnp.transpose(xcol, (0, 3, 4, 1, 2)).reshape(M, K)       # rows (b,ho,wo); K=(di,dj,c)
    xcol = xcol.astype(jnp.bfloat16)                                # halve the HBM input stream

    # Conv weight as (K, N) bf16 with matching K ordering; pad C_out to a
    # lane-dense multiple of 128 (this also fills the 256-wide MXU result dim
    # for C_out in (128, 256]).
    # TODO(synk): for tiny C_out a transposed (N,K)x(K,M) orientation would avoid
    # the C_out->128 output padding and the final NCHW transpose.
    N = _round_up(C_out, 128)
    wmat = jnp.transpose(conv_w, (2, 3, 1, 0)).reshape(K, C_out)
    wmat = jnp.pad(wmat, ((0, 0), (0, N - C_out))).astype(jnp.bfloat16)
    g = jnp.pad(gamma.astype(jnp.float32), (0, N - C_out), constant_values=1.0)
    b = jnp.pad(beta.astype(jnp.float32), (0, N - C_out))

    TM, M_pad, vmem_limit = _choose_tile(M, K, N)
    NM = M_pad // TM
    if M_pad != M:
        # Zero rows: relu(0)=0 and 0 @ W = 0, so padding contributes nothing to
        # the BN statistics and its output rows are sliced away below.
        xcol = jnp.pad(xcol, ((0, M_pad - M), (0, 0)))

    cparams = pltpu.CompilerParams(dimension_semantics=("parallel",),
                                   vmem_limit_bytes=vmem_limit)
    x_spec = pl.BlockSpec((TM, K), lambda i: (i, 0))
    w_spec = pl.BlockSpec((K, N), lambda i: (0, 0))
    vec_spec = pl.BlockSpec((1, N), lambda i: (0, 0))
    # Note: wmat / scale / shift are grid-invariant; pl.Buffered(1) would shave a
    # few KiB of VMEM but is skipped here since their footprint is negligible.

    # Pass 1: per-tile partial BN statistics (independent output blocks -> the M
    # axis is "parallel", so v7x can split the tiles across its two TensorCores).
    psum, pssq = pl.pallas_call(
        _stats_kernel,
        out_shape=(jax.ShapeDtypeStruct((NM, 8, N), jnp.float32),
                   jax.ShapeDtypeStruct((NM, 8, N), jnp.float32)),
        grid=(NM,),
        in_specs=[x_spec, w_spec],
        out_specs=(pl.BlockSpec((1, 8, N), lambda i: (i, 0, 0)),
                   pl.BlockSpec((1, 8, N), lambda i: (i, 0, 0))),
        compiler_params=cparams,
    )(xcol, wmat)

    # Tiny O(N) reduction + BN coefficient math (biased batch stats, as PyTorch
    # training-mode BN). var is clamped at 0 to guard rsqrt against f32
    # cancellation in E[h^2] - E[h]^2.
    inv_n = 1.0 / float(M)
    tot_sum = jnp.sum(psum[:, 0, :], axis=0)
    tot_ssq = jnp.sum(pssq[:, 0, :], axis=0)
    mean = tot_sum * inv_n
    var = jnp.maximum(tot_ssq * inv_n - mean * mean, 0.0)
    scale = g * jax.lax.rsqrt(var + BN_EPS)
    shift = b - mean * scale
    scale2 = scale.reshape(1, N)
    shift2 = shift.reshape(1, N)

    # Pass 2: recompute h and normalize; fully parallel over M tiles.
    out = pl.pallas_call(
        _norm_kernel,
        out_shape=jax.ShapeDtypeStruct((M_pad, N), jnp.float32),
        grid=(NM,),
        in_specs=[x_spec, w_spec, vec_spec, vec_spec],
        out_specs=pl.BlockSpec((TM, N), lambda i: (i, 0)),
        compiler_params=cparams,
    )(xcol, wmat, scale2, shift2)

    out = out[:M, :C_out].reshape(B, Ho, Wo, C_out)
    return jnp.transpose(out, (0, 3, 1, 2))                 # back to NCHW


def ref_forward(x, conv_w, gamma, beta, *, stride, padding):
    """Pure-JAX reference mirroring the PyTorch module (NCHW, training-mode BN)."""
    x = jnp.maximum(x, 0.0)
    y = jax.lax.conv_general_dilated(
        x, conv_w, window_strides=(stride, stride),
        padding=[(padding, padding), (padding, padding)],
        dimension_numbers=("NCHW", "OIHW", "NCHW"), precision="highest")
    mean = jnp.mean(y, axis=(0, 2, 3), keepdims=True)
    var = jnp.mean((y - mean) ** 2, axis=(0, 2, 3), keepdims=True)
    yn = (y - mean) * jax.lax.rsqrt(var + BN_EPS)
    return yn * gamma[None, :, None, None] + beta[None, :, None, None]


if __name__ == "__main__":
    key = jax.random.PRNGKey(0)
    B = 2
    configs = [
        # (C_in, C_out, kernel_size, stride, padding, H, W)
        (4, 32, 1, 1, 0, 16, 16),   # canonical ReLUConvBN(C, C, 1, 1, 0) usage
        (4, 32, 3, 2, 1, 16, 16),   # general kernel / stride / padding
    ]
    for idx, (C_in, C_out, k, s, p, H, W) in enumerate(configs):
        k_x, k_w, k_g, k_b, key = jax.random.split(key, 5)
        x = jax.random.normal(k_x, (B, C_in, H, W), jnp.float32)
        conv_w = 0.1 * jax.random.normal(k_w, (C_out, C_in, k, k), jnp.float32)
        gamma = 1.0 + 0.1 * jax.random.normal(k_g, (C_out,), jnp.float32)
        beta = 0.1 * jax.random.normal(k_b, (C_out,), jnp.float32)

        out = relu_conv_bn_forward(x, conv_w, gamma, beta, stride=s, padding=p)
        out = jax.block_until_ready(out)

        ref = ref_forward(x, conv_w, gamma, beta, stride=s, padding=p)
        assert out.shape == ref.shape, (out.shape, ref.shape)
        err = float(jnp.max(jnp.abs(out - ref)))
        # bf16 matmul operands vs f32 reference -> small, bounded error.
        assert err < 5e-2, f"config {idx}: max abs err vs reference: {err}"

    print("KERNEL_OK")
</pallas_src>

<mosaic_0001>
module attributes {stable_mosaic.version = 11 : i64} {
  func.func @_norm_kernel(%arg0: i32, %arg1: memref<512x4xbf16, #tpu.memory_space<vmem>>, %arg2: memref<4x128xbf16, #tpu.memory_space<vmem>>, %arg3: memref<1x128xf32, #tpu.memory_space<vmem>>, %arg4: memref<1x128xf32, #tpu.memory_space<vmem>>, %arg5: memref<512x128xf32, #tpu.memory_space<vmem>>) attributes {dimension_semantics = [#tpu.dimension_semantics<parallel>], iteration_bounds = array<i64: 1>, scalar_prefetch = 0 : i64, scratch_operands = 0 : i64, tpu.core_type = #tpu.core_type<tc>, window_params = [{transform_indices = @transform_0, window_bounds = array<i64: 512, 4>}, {pipeline_mode = #tpu.pipeline_mode<synchronous>, transform_indices = @transform_1, window_bounds = array<i64: 4, 128>}, {pipeline_mode = #tpu.pipeline_mode<synchronous>, transform_indices = @transform_2, window_bounds = array<i64: 1, 128>}, {pipeline_mode = #tpu.pipeline_mode<synchronous>, transform_indices = @transform_3, window_bounds = array<i64: 1, 128>}, {transform_indices = @transform_4, window_bounds = array<i64: 512, 128>}]} {
    %c0 = arith.constant 0 : index
    %c0_0 = arith.constant 0 : index
    %0 = vector.load %arg1[%c0, %c0_0] : memref<512x4xbf16, #tpu.memory_space<vmem>>, vector<512x4xbf16>
    %cst = arith.constant 0.000000e+00 : bf16
    %1 = vector.broadcast %cst : bf16 to vector<512x4xbf16>
    %2 = arith.maximumf %0, %1 : vector<512x4xbf16>
    %c0_1 = arith.constant 0 : index
    %c0_2 = arith.constant 0 : index
    %3 = vector.load %arg2[%c0_1, %c0_2] : memref<4x128xbf16, #tpu.memory_space<vmem>>, vector<4x128xbf16>
    %cst_3 = arith.constant dense<0.000000e+00> : vector<512x128xf32>
    %4 = tpu.matmul %2, %3, %cst_3 {dimension_numbers = #tpu.dot_dimension_numbers<[1], [0], [0], [1], [0, 0, 1, 1], [], []>} : vector<512x4xbf16>, vector<4x128xbf16>, vector<512x128xf32> -> vector<512x128xf32>
    %c0_4 = arith.constant 0 : index
    %c0_5 = arith.constant 0 : index
    %5 = vector.load %arg3[%c0_4, %c0_5] : memref<1x128xf32, #tpu.memory_space<vmem>>, vector<1x128xf32>
    %6 = vector.broadcast %5 : vector<1x128xf32> to vector<512x128xf32>
    %7 = arith.mulf %4, %6 : vector<512x128xf32>
    %c0_6 = arith.constant 0 : index
    %c0_7 = arith.constant 0 : index
    %8 = vector.load %arg4[%c0_6, %c0_7] : memref<1x128xf32, #tpu.memory_space<vmem>>, vector<1x128xf32>
    %9 = vector.broadcast %8 : vector<1x128xf32> to vector<512x128xf32>
    %10 = arith.addf %7, %9 : vector<512x128xf32>
    %c0_8 = arith.constant 0 : index
    %c0_9 = arith.constant 0 : index
    %11 = vector.load %arg5[%c0_8, %c0_9] : memref<512x128xf32, #tpu.memory_space<vmem>>, vector<512x128xf32>
    tpu.vector_store %arg5[%c0_8, %c0_9], %10 {strides = array<i32>} : memref<512x128xf32, #tpu.memory_space<vmem>>, vector<512x128xf32>,
    return
  }
  func.func @transform_0(%arg0: i32) -> (i32, i32) {
    %c0_i32 = arith.constant 0 : i32
    %c0_i32_0 = arith.constant 0 : i32
    return %arg0, %c0_i32 : i32, i32
  }
  func.func @transform_1(%arg0: i32) -> (i32, i32) {
    %c0_i32 = arith.constant 0 : i32
    %c0_i32_0 = arith.constant 0 : i32
    %c0_i32_1 = arith.constant 0 : i32
    return %c0_i32, %c0_i32_0 : i32, i32
  }
  func.func @transform_2(%arg0: i32) -> (i32, i32) {
    %c0_i32 = arith.constant 0 : i32
    %c0_i32_0 = arith.constant 0 : i32
    %c0_i32_1 = arith.constant 0 : i32
    return %c0_i32, %c0_i32_0 : i32, i32
  }
  func.func @transform_3(%arg0: i32) -> (i32, i32) {
    %c0_i32 = arith.constant 0 : i32
    %c0_i32_0 = arith.constant 0 : i32
    %c0_i32_1 = arith.constant 0 : i32
    return %c0_i32, %c0_i32_0 : i32, i32
  }
  func.func @transform_4(%arg0: i32) -> (i32, i32) {
    %c0_i32 = arith.constant 0 : i32
    %c0_i32_0 = arith.constant 0 : i32
    return %arg0, %c0_i32 : i32, i32
  }
}

module attributes {stable_mosaic.version = 11 : i64} {
  func.func @_stats_kernel(%arg0: i32, %arg1: memref<512x4xbf16, #tpu.memory_space<vmem>>, %arg2: memref<4x128xbf16, #tpu.memory_space<vmem>>, %arg3: memref<1x8x128xf32, #tpu.memory_space<vmem>>, %arg4: memref<1x8x128xf32, #tpu.memory_space<vmem>>) attributes {dimension_semantics = [#tpu.dimension_semantics<parallel>], iteration_bounds = array<i64: 1>, scalar_prefetch = 0 : i64, scratch_operands = 0 : i64, tpu.core_type = #tpu.core_type<tc>, window_params = [{transform_indices = @transform_0, window_bounds = array<i64: 512, 4>}, {pipeline_mode = #tpu.pipeline_mode<synchronous>, transform_indices = @transform_1, window_bounds = array<i64: 4, 128>}, {transform_indices = @transform_2, window_bounds = array<i64: 1, 8, 128>}, {transform_indices = @transform_3, window_bounds = array<i64: 1, 8, 128>}]} {
    %c0 = arith.constant 0 : index
    %c0_0 = arith.constant 0 : index
    %0 = vector.load %arg1[%c0, %c0_0] : memref<512x4xbf16, #tpu.memory_space<vmem>>, vector<512x4xbf16>
    %cst = arith.constant 0.000000e+00 : bf16
    %1 = vector.broadcast %cst : bf16 to vector<512x4xbf16>
    %2 = arith.maximumf %0, %1 : vector<512x4xbf16>
    %c0_1 = arith.constant 0 : index
    %c0_2 = arith.constant 0 : index
    %3 = vector.load %arg2[%c0_1, %c0_2] : memref<4x128xbf16, #tpu.memory_space<vmem>>, vector<4x128xbf16>
    %cst_3 = arith.constant dense<0.000000e+00> : vector<512x128xf32>
    %4 = tpu.matmul %2, %3, %cst_3 {dimension_numbers = #tpu.dot_dimension_numbers<[1], [0], [0], [1], [0, 0, 1, 1], [], []>} : vector<512x4xbf16>, vector<4x128xbf16>, vector<512x128xf32> -> vector<512x128xf32>
    %cst_4 = arith.constant dense<0.000000e+00> : vector<128xf32>
    %5 = vector.multi_reduction <add>, %4, %cst_4 [0] : vector<512x128xf32> to vector<128xf32>
    %6 = vector.shape_cast %5 : vector<128xf32> to vector<1x128xf32>
    %7 = arith.mulf %4, %4 : vector<512x128xf32>
    %cst_5 = arith.constant dense<0.000000e+00> : vector<128xf32>
    %8 = vector.multi_reduction <add>, %7, %cst_5 [0] : vector<512x128xf32> to vector<128xf32>
    %9 = vector.shape_cast %8 : vector<128xf32> to vector<1x128xf32>
    %10 = vector.shape_cast %6 : vector<1x128xf32> to vector<1x1x128xf32>
    %11 = vector.shape_cast %10 : vector<1x1x128xf32> to vector<1x1x128xf32>
    %12 = vector.broadcast %11 : vector<1x1x128xf32> to vector<1x8x128xf32>
    %c0_6 = arith.constant 0 : index
    %c0_7 = arith.constant 0 : index
    %c0_8 = arith.constant 0 : index
    %13 = vector.load %arg3[%c0_6, %c0_7, %c0_8] : memref<1x8x128xf32, #tpu.memory_space<vmem>>, vector<1x8x128xf32>
    tpu.vector_store %arg3[%c0_6, %c0_7, %c0_8], %12 {strides = array<i32>} : memref<1x8x128xf32, #tpu.memory_space<vmem>>, vector<1x8x128xf32>,
    %14 = vector.shape_cast %9 : vector<1x128xf32> to vector<1x1x128xf32>
    %15 = vector.shape_cast %14 : vector<1x1x128xf32> to vector<1x1x128xf32>
    %16 = vector.broadcast %15 : vector<1x1x128xf32> to vector<1x8x128xf32>
    %c0_9 = arith.constant 0 : index
    %c0_10 = arith.constant 0 : index
    %c0_11 = arith.constant 0 : index
    %17 = vector.load %arg4[%c0_9, %c0_10, %c0_11] : memref<1x8x128xf32, #tpu.memory_space<vmem>>, vector<1x8x128xf32>
    tpu.vector_store %arg4[%c0_9, %c0_10, %c0_11], %16 {strides = array<i32>} : memref<1x8x128xf32, #tpu.memory_space<vmem>>, vector<1x8x128xf32>,
    return
  }
  func.func @transform_0(%arg0: i32) -> (i32, i32) {
    %c0_i32 = arith.constant 0 : i32
    %c0_i32_0 = arith.constant 0 : i32
    return %arg0, %c0_i32 : i32, i32
  }
  func.func @transform_1(%arg0: i32) -> (i32, i32) {
    %c0_i32 = arith.constant 0 : i32
    %c0_i32_0 = arith.constant 0 : i32
    %c0_i32_1 = arith.constant 0 : i32
    return %c0_i32, %c0_i32_0 : i32, i32
  }
  func.func @transform_2(%arg0: i32) -> (i32, i32, i32) {
    %c0_i32 = arith.constant 0 : i32
    %c0_i32_0 = arith.constant 0 : i32
    %c0_i32_1 = arith.constant 0 : i32
    return %arg0, %c0_i32, %c0_i32_0 : i32, i32, i32
  }
  func.func @transform_3(%arg0: i32) -> (i32, i32, i32) {
    %c0_i32 = arith.constant 0 : i32
    %c0_i32_0 = arith.constant 0 : i32
    %c0_i32_1 = arith.constant 0 : i32
    return %arg0, %c0_i32, %c0_i32_0 : i32, i32, i32
  }
}

</mosaic_0001>

<bundles_post_ra>
// kernel: relu_conv_bn_forward.3
= control target key start
LH: loop header
LB: loop body
LE: loop exit
PB: predicated region body
PF: predicated region fallthrough
CT: control target
= control target key end

     0   :  { %vm405_vm0 = vcmask 1041408   ;;  %v1115_v4 = vmov 0   ;;  %vm308_vm1 = vcmask 31744   ;;  %s1576_s0 = inlined_call_operand.vmem [shape: bf16[512,4], index: 0, kind: input, shape index: {}]   ;;  %s1577_s1 = inlined_call_operand.vmem [shape: bf16[4,128], index: 1, kind: input, shape index: {}]   ;;  %s1578_s2 = inlined_call_operand.vmem [shape: f32[1,128], index: 2, kind: input, shape index: {}]   ;;  %s1579_s3 = inlined_call_operand.vmem [shape: f32[1,128], index: 3, kind: input, shape index: {}]   ;;  %s1580_s4 = inlined_call_operand.hbm [shape: f32[512,128], index: 4, kind: output, shape index: {}]  }
   0x1   :  { %v147_v0 = vld [vmem:[%s1577_s1] sm:$0x3]  ;;  %v20_v3 = vld [vmem:[%s1576_s0 + $0x4] sm:$0xf]  ;;  %v21_v10 = vld [vmem:[%s1576_s0 + $0x8] sm:$0xf] }
   0x2   :  { %v19_v1 = vld [vmem:[%s1576_s0] sm:$0xf]  ;;  %1087 = vmatprep.subr.msk.bf16.mxu0 %vm405_vm0, %v147_v0  ;;  %1088 = vmatprep.subr.msk.bf16.mxu1 %vm405_vm0, %v147_v0  ;;  %v407_v2 = vsel %vm405_vm0, %v147_v0, 0  ;;  %v84_v7 = vmax.bf16 %v1115_v4, %v20_v3  ;;  %v52_v8 = vld [vmem:[%s1576_s0 + $0x84] sm:$0xf]  ;;  %v85_v13 = vmax.bf16 %v1115_v4, %v21_v10 }
   0x3   :  { %v83_v5 = vmax.bf16 %v1115_v4, %v19_v1  ;;  %v51_v6 = vld [vmem:[%s1576_s0 + $0x80] sm:$0xf]  ;;  %1020 = vmatpush3.bf16.msra.mxu0 %v407_v2  ;;  %1086 = vmatpush3.bf16.msra.mxu1 %v407_v2  ;;  %v22_v11 = vld [vmem:[%s1576_s0 + $0xc] sm:$0xf]  ;;  %v116_v12 = vmax.bf16 %v1115_v4, %v52_v8  ;;  %v53_v15 = vld [vmem:[%s1576_s0 + $0x88] sm:$0xf] }
   0x4   :  { %v115_v9 = vmax.bf16 %v1115_v4, %v51_v6  ;;  %v86_v14 = vmax.bf16 %v1115_v4, %v22_v11  ;;  %v54_v16 = vld [vmem:[%s1576_s0 + $0x8c] sm:$0xf]  ;;  %v23_v17 = vld [vmem:[%s1576_s0 + $0x10] sm:$0xf]  ;;  %v117_v19 = vmax.bf16 %v1115_v4, %v53_v15  ;;  %v24_v21 = vld [vmem:[%s1576_s0 + $0x14] sm:$0xf] }
   0x5   :  { %v920_v18 = vcombine.low %v83_v5, %v84_v7  ;;  %v118_v20 = vmax.bf16 %v1115_v4, %v54_v16  ;;  %v87_v22 = vmax.bf16 %v1115_v4, %v23_v17  ;;  %v55_v23 = vld [vmem:[%s1576_s0 + $0x90] sm:$0xf]  ;;  %v56_v24 = vld [vmem:[%s1576_s0 + $0x94] sm:$0xf]  ;;  %v88_v27 = vmax.bf16 %v1115_v4, %v24_v21  ;;  %v25_v29 = vld [vmem:[%s1576_s0 + $0x18] sm:$0xf] }
   0x6   :  { %v936_v25 = vcombine.low %v115_v9, %v116_v12  ;;  %v921_v26 = vcombine.low %v85_v13, %v86_v14  ;;  %v119_v28 = vmax.bf16 %v1115_v4, %v55_v23  ;;  %v26_v30 = vld [vmem:[%s1576_s0 + $0x1c] sm:$0xf]  ;;  %v57_v31 = vld [vmem:[%s1576_s0 + $0x98] sm:$0xf]  ;;  %v120_v33 = vmax.bf16 %v1115_v4, %v56_v24  ;;  %v27_v36 = vld [vmem:[%s1576_s0 + $0x20] sm:$0xf] }
   0x7   :  { %1021 = vmatprep.mubr.msk.bf16.mxu0 %vm308_vm1, %v920_v18  ;;  %v937_v32 = vcombine.low %v117_v19, %v118_v20  ;;  %v89_v34 = vmax.bf16 %v1115_v4, %v25_v29  ;;  %v58_v35 = vld [vmem:[%s1576_s0 + $0x9c] sm:$0xf]  ;;  %v28_v37 = vld [vmem:[%s1576_s0 + $0x24] sm:$0xf]  ;;  %v922_v38 = vcombine.low %v87_v22, %v88_v27  ;;  %v90_v39 = vmax.bf16 %v1115_v4, %v26_v30  ;;  %v59_v41 = vld [vmem:[%s1576_s0 + $0xa0] sm:$0xf] }
   0x8   :  { %1053 = vmatprep.mubr.msk.bf16.mxu1 %vm308_vm1, %v936_v25  ;;  %1022 = vmatmul.mubr.msk.bf16.vlgmr.msra.gmra.mxu0 %vm308_vm1, %v921_v26  ;;  %v121_v40 = vmax.bf16 %v1115_v4, %v57_v31  ;;  %v60_v42 = vld [vmem:[%s1576_s0 + $0xa4] sm:$0xf]  ;;  %v938_v43 = vcombine.low %v119_v28, %v120_v33  ;;  %v122_v44 = vmax.bf16 %v1115_v4, %v58_v35  ;;  %v29_v52 = vld [vmem:[%s1576_s0 + $0x28] sm:$0xf]  ;;  %v30_v53 = vld [vmem:[%s1576_s0 + $0x2c] sm:$0xf] }
   0x9   :  { %1054 = vmatmul.mubr.msk.bf16.vlgmr.msra.gmra.mxu1 %vm308_vm1, %v937_v32  ;;  %v91_v45 = vmax.bf16 %v1115_v4, %v27_v36  ;;  %v92_v46 = vmax.bf16 %v1115_v4, %v28_v37  ;;  %1025 = vmatprep.mubr.msk.bf16.mxu0 %vm308_vm1, %v922_v38  ;;  %v123_v47 = vmax.bf16 %v1115_v4, %v59_v41  ;;  %v61_v54 = vld [vmem:[%s1576_s0 + $0xa8] sm:$0xf]  ;;  %v62_v56 = vld [vmem:[%s1576_s0 + $0xac] sm:$0xf]  ;;  %v31_v57 = vld [vmem:[%s1576_s0 + $0x30] sm:$0xf] }
   0xa   :  { %v124_v48 = vmax.bf16 %v1115_v4, %v60_v42  ;;  %1057 = vmatprep.mubr.msk.bf16.mxu1 %vm308_vm1, %v938_v43  ;;  %v923_v49 = vcombine.low %v89_v34, %v90_v39  ;;  %v939_v50 = vcombine.low %v121_v40, %v122_v44  ;;  %v32_v58 = vld [vmem:[%s1576_s0 + $0x34] sm:$0xf]  ;;  %v63_v59 = vld [vmem:[%s1576_s0 + $0xb0] sm:$0xf]  ;;  %v93_v61 = vmax.bf16 %v1115_v4, %v29_v52  ;;  %v33_v9 = vld [vmem:[%s1576_s0 + $0x38] sm:$0xf] }
   0xb   :  { %v924_v51 = vcombine.low %v91_v45, %v92_v46  ;;  %v64_v60 = vld [vmem:[%s1576_s0 + $0xb4] sm:$0xf]  ;;  %v94_v62 = vmax.bf16 %v1115_v4, %v30_v53  ;;  %v125_v63 = vmax.bf16 %v1115_v4, %v61_v54  ;;  %v126_v0 = vmax.bf16 %v1115_v4, %v62_v56  ;;  %v34_v10 = vld [vmem:[%s1576_s0 + $0x3c] sm:$0xf]  ;;  %v65_v11 = vld [vmem:[%s1576_s0 + $0xb8] sm:$0xf] }
   0xc   :  { %v940_v55 = vcombine.low %v123_v47, %v124_v48  ;;  %v95_v1 = vmax.bf16 %v1115_v4, %v31_v57  ;;  %v96_v2 = vmax.bf16 %v1115_v4, %v32_v58  ;;  %v127_v3 = vmax.bf16 %v1115_v4, %v63_v59  ;;  %v66_v13 = vld [vmem:[%s1576_s0 + $0xbc] sm:$0xf]  ;;  %v35_v14 = vld [vmem:[%s1576_s0 + $0x40] sm:$0xf]  ;;  %v36_v15 = vld [vmem:[%s1576_s0 + $0x44] sm:$0xf] }
   0xd   :  { %v128_v5 = vmax.bf16 %v1115_v4, %v64_v60  ;;  %v925_v6 = vcombine.low %v93_v61, %v94_v62  ;;  %v941_v7 = vcombine.low %v125_v63, %v126_v0  ;;  %v67_v16 = vld [vmem:[%s1576_s0 + $0xc0] sm:$0xf]  ;;  %v68_v17 = vld [vmem:[%s1576_s0 + $0xc4] sm:$0xf] }
   0xe   :  { %v926_v8 = vcombine.low %v95_v1, %v96_v2 }
   0xf   :  { %v942_v12 = vcombine.low %v127_v3, %v128_v5 }
  0x10   :  { %1026 = vmatmul.mubr.msk.bf16.gmra.mxu0 %vm308_vm1, %v923_v49 }
  0x11   :  { %1058 = vmatmul.mubr.msk.bf16.gmra.mxu1 %vm308_vm1, %v939_v50  ;;  %1029 = vmatprep.mubr.msk.bf16.mxu0 %vm308_vm1, %v924_v51 }
  0x12   :  { %1061 = vmatprep.mubr.msk.bf16.mxu1 %vm308_vm1, %v940_v55 }
  0x13   :  { %9 = vsyncpa [#allocation3], 0  ;;  %v97_v18 = vmax.bf16 %v1115_v4, %v33_v9  ;;  %v98_v19 = vmax.bf16 %v1115_v4, %v34_v10  ;;  %v129_v20 = vmax.bf16 %v1115_v4, %v65_v11  ;;  %v130_v21 = vmax.bf16 %v1115_v4, %v66_v13  ;;  %v37_v29 = vld [vmem:[%s1576_s0 + $0x48] sm:$0xf]  ;;  %v38_v30 = vld [vmem:[%s1576_s0 + $0x4c] sm:$0xf] }
  0x14   :  { %v99_v22 = vmax.bf16 %v1115_v4, %v35_v14  ;;  %v100_v23 = vmax.bf16 %v1115_v4, %v36_v15  ;;  %v131_v24 = vmax.bf16 %v1115_v4, %v67_v16  ;;  %v132_v25 = vmax.bf16 %v1115_v4, %v68_v17  ;;  %v69_v31 = vld [vmem:[%s1576_s0 + $0xc8] sm:$0xf]  ;;  %v70_v33 = vld [vmem:[%s1576_s0 + $0xcc] sm:$0xf]  ;;  %v39_v34 = vld [vmem:[%s1576_s0 + $0x50] sm:$0xf] }
  0x15   :  { %v927_v26 = vcombine.low %v97_v18, %v98_v19  ;;  %v943_v27 = vcombine.low %v129_v20, %v130_v21  ;;  %v40_v35 = vld [vmem:[%s1576_s0 + $0x54] sm:$0xf]  ;;  %v71_v36 = vld [vmem:[%s1576_s0 + $0xd0] sm:$0xf]  ;;  %v101_v38 = vmax.bf16 %v1115_v4, %v37_v29  ;;  %v102_v39 = vmax.bf16 %v1115_v4, %v38_v30  ;;  %v41_v49 = vld [vmem:[%s1576_s0 + $0x58] sm:$0xf] }
  0x16   :  { %v928_v28 = vcombine.low %v99_v22, %v100_v23  ;;  %v944_v32 = vcombine.low %v131_v24, %v132_v25  ;;  %v72_v37 = vld [vmem:[%s1576_s0 + $0xd4] sm:$0xf]  ;;  %v133_v40 = vmax.bf16 %v1115_v4, %v69_v31  ;;  %v134_v41 = vmax.bf16 %v1115_v4, %v70_v33  ;;  %v42_v50 = vld [vmem:[%s1576_s0 + $0x5c] sm:$0xf]  ;;  %v73_v51 = vld [vmem:[%s1576_s0 + $0xd8] sm:$0xf] }
  0x17   :  { %v103_v42 = vmax.bf16 %v1115_v4, %v39_v34  ;;  %v104_v43 = vmax.bf16 %v1115_v4, %v40_v35  ;;  %v135_v44 = vmax.bf16 %v1115_v4, %v71_v36  ;;  %v136_v45 = vmax.bf16 %v1115_v4, %v72_v37  ;;  %v74_v53 = vld [vmem:[%s1576_s0 + $0xdc] sm:$0xf]  ;;  %v43_v54 = vld [vmem:[%s1576_s0 + $0x60] sm:$0xf]  ;;  %v44_v55 = vld [vmem:[%s1576_s0 + $0x64] sm:$0xf] }
  0x18   :  { %1030 = vmatmul.mubr.msk.bf16.gmra.mxu0 %vm308_vm1, %v925_v6  ;;  %v929_v46 = vcombine.low %v101_v38, %v102_v39  ;;  %v945_v47 = vcombine.low %v133_v40, %v134_v41  ;;  %v75_v56 = vld [vmem:[%s1576_s0 + $0xe0] sm:$0xf]  ;;  %v76_v57 = vld [vmem:[%s1576_s0 + $0xe4] sm:$0xf]  ;;  %v105_v58 = vmax.bf16 %v1115_v4, %v41_v49  ;;  %v106_v59 = vmax.bf16 %v1115_v4, %v42_v50  ;;  %v45_v6 = vld [vmem:[%s1576_s0 + $0x68] sm:$0xf] }
  0x19   :  { %1062 = vmatmul.mubr.msk.bf16.gmra.mxu1 %vm308_vm1, %v941_v7  ;;  %1033 = vmatprep.mubr.msk.bf16.mxu0 %vm308_vm1, %v926_v8  ;;  %v930_v48 = vcombine.low %v103_v42, %v104_v43  ;;  %v946_v52 = vcombine.low %v135_v44, %v136_v45  ;;  %v137_v60 = vmax.bf16 %v1115_v4, %v73_v51  ;;  %v46_v7 = vld [vmem:[%s1576_s0 + $0x6c] sm:$0xf]  ;;  %v77_v8 = vld [vmem:[%s1576_s0 + $0xe8] sm:$0xf]  ;;  %v47_v11 = vld [vmem:[%s1576_s0 + $0x70] sm:$0xf] }
  0x1a   :  { %1065 = vmatprep.mubr.msk.bf16.mxu1 %vm308_vm1, %v942_v12  ;;  %v138_v61 = vmax.bf16 %v1115_v4, %v74_v53  ;;  %v107_v62 = vmax.bf16 %v1115_v4, %v43_v54  ;;  %v108_v63 = vmax.bf16 %v1115_v4, %v44_v55  ;;  %v139_v0 = vmax.bf16 %v1115_v4, %v75_v56  ;;  %v78_v10 = vld [vmem:[%s1576_s0 + $0xec] sm:$0xf]  ;;  %v48_v12 = vld [vmem:[%s1576_s0 + $0x74] sm:$0xf]  ;;  %v79_v13 = vld [vmem:[%s1576_s0 + $0xf0] sm:$0xf] }
  0x1b   :  { %v140_v1 = vmax.bf16 %v1115_v4, %v76_v57  ;;  %v931_v2 = vcombine.low %v105_v58, %v106_v59  ;;  %v80_v14 = vld [vmem:[%s1576_s0 + $0xf4] sm:$0xf]  ;;  %v109_v15 = vmax.bf16 %v1115_v4, %v45_v6  ;;  %v110_v16 = vmax.bf16 %v1115_v4, %v46_v7  ;;  %v81_v29 = vld [vmem:[%s1576_s0 + $0xf8] sm:$0xf]  ;;  %v82_v30 = vld [vmem:[%s1576_s0 + $0xfc] sm:$0xf] }
  0x1c   :  { %v947_v3 = vcombine.low %v137_v60, %v138_v61  ;;  %v932_v5 = vcombine.low %v107_v62, %v108_v63  ;;  %v141_v17 = vmax.bf16 %v1115_v4, %v77_v8  ;;  %v142_v18 = vmax.bf16 %v1115_v4, %v78_v10  ;;  %v1438_v37 = vld [vmem:[%s1578_s2] ss:$0 sm:$0xff]  ;;  %s1116_s2 = smov [#allocation2]  }
  0x1d   :  { %v948_v9 = vcombine.low %v139_v0, %v140_v1  ;;  %v111_v19 = vmax.bf16 %v1115_v4, %v47_v11  ;;  %v112_v20 = vmax.bf16 %v1115_v4, %v48_v12  ;;  %v143_v21 = vmax.bf16 %v1115_v4, %v79_v13  ;;  %v1443_v39 = vld [vmem:[%s1579_s3] ss:$0 sm:$0xff]  ;;  %s909_s3 = sshll.u32 %s1116_s2, 4  ;;  %s910_s3 = int_to_ptr.vmem [resolvable:$true] %s909_s3 }
  0x1e   :  { %v144_v22 = vmax.bf16 %v1115_v4, %v80_v14  ;;  %v933_v23 = vcombine.low %v109_v15, %v110_v16  ;;  %v949_v24 = vcombine.low %v141_v17, %v142_v18  ;;  %v145_v33 = vmax.bf16 %v1115_v4, %v81_v29  ;;  %s1093_s13 = scalar_lea.vmem %s910_s3, 8192  ;;  %p1098_p1 = scmp.lt.s32.totalorder %s910_s3, %s910_s3 }
  0x1f   :  { %v934_v25 = vcombine.low %v111_v19, %v112_v20  ;;  %v146_v34 = vmax.bf16 %v1115_v4, %v82_v30  ;;  %p1094_p0 = scmp.ne.s32.totalorder %s910_s3, %s1093_s13  ;;  %p1099_p2 = scmp.lt.s32.totalorder %s1093_s13, %s1093_s13 }
  0x20   :  { %1034 = vmatmul.mubr.msk.bf16.gmra.mxu0 %vm308_vm1, %v927_v26  ;;  %v49_v26 = vld [vmem:[%s1576_s0 + $0x78] sm:$0xf] }
  0x21   :  { %1066 = vmatmul.mubr.msk.bf16.gmra.mxu1 %vm308_vm1, %v943_v27  ;;  %1037 = vmatprep.mubr.msk.bf16.mxu0 %vm308_vm1, %v928_v28  ;;  %v50_v27 = vld [vmem:[%s1576_s0 + $0x7c] sm:$0xf]  ;;  %v950_v28 = vcombine.low %v143_v21, %v144_v22  ;;  %v113_v31 = vmax.bf16 %v1115_v4, %v49_v26  ;;  %v951_v36 = vcombine.low %v145_v33, %v146_v34  ;;  %p1100_p3 = por %p1099_p2, %p1098_p1 }
  0x22   :  { %1069 = vmatprep.mubr.msk.bf16.mxu1 %vm308_vm1, %v944_v32  ;;  %v114_v32 = vmax.bf16 %v1115_v4, %v50_v27 }
  0x23   :  { %p1101_p4 = pnand %p1100_p3, %p1094_p0 }
  0x24   :  { %v935_v35 = vcombine.low %v113_v31, %v114_v32 }
  0x28   :  { %1038 = vmatmul.mubr.msk.bf16.gmra.mxu0 %vm308_vm1, %v929_v46 }
  0x29   :  { %1070 = vmatmul.mubr.msk.bf16.gmra.mxu1 %vm308_vm1, %v945_v47  ;;  %1041 = vmatprep.mubr.msk.bf16.mxu0 %vm308_vm1, %v930_v48 }
  0x2a   :  { %1073 = vmatprep.mubr.msk.bf16.mxu1 %vm308_vm1, %v946_v52 }
  0x30   :  { %1042 = vmatmul.mubr.msk.bf16.gmra.mxu0 %vm308_vm1, %v931_v2 }
  0x31   :  { %1074 = vmatmul.mubr.msk.bf16.gmra.mxu1 %vm308_vm1, %v947_v3  ;;  %1045 = vmatprep.mubr.msk.bf16.mxu0 %vm308_vm1, %v932_v5 }
  0x32   :  { %1077 = vmatprep.mubr.msk.bf16.mxu1 %vm308_vm1, %v948_v9 }
  0x38   :  { %1046 = vmatmul.mubr.msk.bf16.gmra.mxu0 %vm308_vm1, %v933_v23 }
  0x39   :  { %1078 = vmatmul.mubr.msk.bf16.gmra.mxu1 %vm308_vm1, %v949_v24  ;;  %1049 = vmatprep.mubr.msk.bf16.mxu0 %vm308_vm1, %v934_v25 }
  0x3a   :  { %1081 = vmatprep.mubr.msk.bf16.mxu1 %vm308_vm1, %v950_v28 }
  0x40   :  { %1050 = vmatmul.mubr.msk.bf16.gmra.mxu0 %vm308_vm1, %v935_v35 }
  0x41   :  { %1082 = vmatmul.mubr.msk.bf16.gmra.mxu1 %vm308_vm1, %v951_v36 }
  0xc8   :  { %v1023_v38 = vpop.f32.mrf.mxu0 }
  0xc9   :  { %v707_v4 = vmul.f32 %v1023_v38, %v1438_v37  ;;  %v1055_v40 = vpop.f32.mrf.mxu1 }
  0xca   :  { %v739_v41 = vmul.f32 %v1055_v40, %v1438_v37  ;;  %v443_v42 = vpop.f32.mrf.mxu0 }
  0xcb   :  { %v778_v43 = vadd.f32 %v1443_v39, %v707_v4  ;;  %v705_v44 = vmul.f32 %v1438_v37, %v443_v42  ;;  %v571_v45 = vpop.f32.mrf.mxu1 }
  0xcc   :  { %v810_v46 = vadd.f32 %v1443_v39, %v739_v41  ;;  %v737_v47 = vmul.f32 %v1438_v37, %v571_v45  ;;  %v1024_v48 = vpop.f32.mrf.mxu0 }
  0xcd   :  { %842 = vst [vmem:[#allocation2 + $0x10] sm:$0xff] %v778_v43  ;;  %v776_v49 = vadd.f32 %v1443_v39, %v705_v44  ;;  %v708_v50 = vmul.f32 %v1024_v48, %v1438_v37  ;;  %v1056_v51 = vpop.f32.mrf.mxu1 }
  0xce   :  { %874 = vst [vmem:[#allocation2 + $0x110] sm:$0xff] %v810_v46  ;;  %v808_v52 = vadd.f32 %v1443_v39, %v737_v47  ;;  %v740_v53 = vmul.f32 %v1056_v51, %v1438_v37  ;;  %v446_v54 = vpop.f32.mrf.mxu0 }
  0xcf   :  { %840 = vst [vmem:[#allocation2] sm:$0xff] %v776_v49  ;;  %v779_v55 = vadd.f32 %v1443_v39, %v708_v50  ;;  %v706_v56 = vmul.f32 %v1438_v37, %v446_v54  ;;  %v574_v57 = vpop.f32.mrf.mxu1 }
  0xd0   :  { %872 = vst [vmem:[#allocation2 + $0x100] sm:$0xff] %v808_v52  ;;  %v811_v58 = vadd.f32 %v1443_v39, %v740_v53  ;;  %v738_v59 = vmul.f32 %v1438_v37, %v574_v57  ;;  %v1027_v60 = vpop.f32.mrf.mxu0 }
  0xd1   :  { %843 = vst [vmem:[#allocation2 + $0x18] sm:$0xff] %v779_v55  ;;  %v777_v61 = vadd.f32 %v1443_v39, %v706_v56  ;;  %v711_v62 = vmul.f32 %v1027_v60, %v1438_v37  ;;  %v1059_v63 = vpop.f32.mrf.mxu1 }
  0xd2   :  { %875 = vst [vmem:[#allocation2 + $0x118] sm:$0xff] %v811_v58  ;;  %v809_v0 = vadd.f32 %v1443_v39, %v738_v59  ;;  %v743_v1 = vmul.f32 %v1059_v63, %v1438_v37  ;;  %v459_v2 = vpop.f32.mrf.mxu0 }
  0xd3   :  { %841 = vst [vmem:[#allocation2 + $0x8] sm:$0xff] %v777_v61  ;;  %v782_v3 = vadd.f32 %v1443_v39, %v711_v62  ;;  %v709_v5 = vmul.f32 %v1438_v37, %v459_v2  ;;  %v587_v6 = vpop.f32.mrf.mxu1 }
  0xd4   :  { %873 = vst [vmem:[#allocation2 + $0x108] sm:$0xff] %v809_v0  ;;  %v814_v7 = vadd.f32 %v1443_v39, %v743_v1  ;;  %v741_v8 = vmul.f32 %v1438_v37, %v587_v6  ;;  %v1028_v9 = vpop.f32.mrf.mxu0 }
  0xd5   :  { %846 = vst [vmem:[#allocation2 + $0x30] sm:$0xff] %v782_v3  ;;  %v780_v10 = vadd.f32 %v1443_v39, %v709_v5  ;;  %v712_v11 = vmul.f32 %v1028_v9, %v1438_v37  ;;  %v1060_v12 = vpop.f32.mrf.mxu1 }
  0xd6   :  { %878 = vst [vmem:[#allocation2 + $0x130] sm:$0xff] %v814_v7  ;;  %v812_v13 = vadd.f32 %v1443_v39, %v741_v8  ;;  %v744_v14 = vmul.f32 %v1060_v12, %v1438_v37  ;;  %v462_v15 = vpop.f32.mrf.mxu0 }
  0xd7   :  { %844 = vst [vmem:[#allocation2 + $0x20] sm:$0xff] %v780_v10  ;;  %v783_v16 = vadd.f32 %v1443_v39, %v712_v11  ;;  %v710_v17 = vmul.f32 %v1438_v37, %v462_v15  ;;  %v590_v18 = vpop.f32.mrf.mxu1 }
  0xd8   :  { %876 = vst [vmem:[#allocation2 + $0x120] sm:$0xff] %v812_v13  ;;  %v815_v19 = vadd.f32 %v1443_v39, %v744_v14  ;;  %v742_v20 = vmul.f32 %v1438_v37, %v590_v18  ;;  %v1031_v21 = vpop.f32.mrf.mxu0 }
  0xd9   :  { %847 = vst [vmem:[#allocation2 + $0x38] sm:$0xff] %v783_v16  ;;  %v781_v22 = vadd.f32 %v1443_v39, %v710_v17  ;;  %v715_v23 = vmul.f32 %v1031_v21, %v1438_v37  ;;  %v1063_v24 = vpop.f32.mrf.mxu1 }
  0xda   :  { %879 = vst [vmem:[#allocation2 + $0x138] sm:$0xff] %v815_v19  ;;  %v813_v25 = vadd.f32 %v1443_v39, %v742_v20  ;;  %v747_v26 = vmul.f32 %v1063_v24, %v1438_v37  ;;  %v475_v27 = vpop.f32.mrf.mxu0 }
  0xdb   :  { %845 = vst [vmem:[#allocation2 + $0x28] sm:$0xff] %v781_v22  ;;  %v786_v28 = vadd.f32 %v1443_v39, %v715_v23  ;;  %v713_v29 = vmul.f32 %v1438_v37, %v475_v27  ;;  %v603_v30 = vpop.f32.mrf.mxu1 }
  0xdc   :  { %877 = vst [vmem:[#allocation2 + $0x128] sm:$0xff] %v813_v25  ;;  %v818_v31 = vadd.f32 %v1443_v39, %v747_v26  ;;  %v745_v32 = vmul.f32 %v1438_v37, %v603_v30  ;;  %v1032_v33 = vpop.f32.mrf.mxu0 }
  0xdd   :  { %850 = vst [vmem:[#allocation2 + $0x50] sm:$0xff] %v786_v28  ;;  %v784_v34 = vadd.f32 %v1443_v39, %v713_v29  ;;  %v716_v35 = vmul.f32 %v1032_v33, %v1438_v37  ;;  %v1064_v36 = vpop.f32.mrf.mxu1 }
  0xde   :  { %882 = vst [vmem:[#allocation2 + $0x150] sm:$0xff] %v818_v31  ;;  %v816_v38 = vadd.f32 %v1443_v39, %v745_v32  ;;  %v748_v4 = vmul.f32 %v1064_v36, %v1438_v37  ;;  %v478_v40 = vpop.f32.mrf.mxu0 }
  0xdf   :  { %848 = vst [vmem:[#allocation2 + $0x40] sm:$0xff] %v784_v34  ;;  %v787_v41 = vadd.f32 %v1443_v39, %v716_v35  ;;  %v714_v42 = vmul.f32 %v1438_v37, %v478_v40  ;;  %v606_v43 = vpop.f32.mrf.mxu1 }
  0xe0   :  { %880 = vst [vmem:[#allocation2 + $0x140] sm:$0xff] %v816_v38  ;;  %v819_v44 = vadd.f32 %v1443_v39, %v748_v4  ;;  %v746_v45 = vmul.f32 %v1438_v37, %v606_v43  ;;  %v1035_v46 = vpop.f32.mrf.mxu0 }
  0xe1   :  { %851 = vst [vmem:[#allocation2 + $0x58] sm:$0xff] %v787_v41  ;;  %v785_v47 = vadd.f32 %v1443_v39, %v714_v42  ;;  %v719_v48 = vmul.f32 %v1035_v46, %v1438_v37  ;;  %v1067_v49 = vpop.f32.mrf.mxu1 }
  0xe2   :  { %883 = vst [vmem:[#allocation2 + $0x158] sm:$0xff] %v819_v44  ;;  %v817_v50 = vadd.f32 %v1443_v39, %v746_v45  ;;  %v751_v51 = vmul.f32 %v1067_v49, %v1438_v37  ;;  %v491_v52 = vpop.f32.mrf.mxu0 }
  0xe3   :  { %849 = vst [vmem:[#allocation2 + $0x48] sm:$0xff] %v785_v47  ;;  %v790_v53 = vadd.f32 %v1443_v39, %v719_v48  ;;  %v717_v54 = vmul.f32 %v1438_v37, %v491_v52  ;;  %v619_v55 = vpop.f32.mrf.mxu1 }
  0xe4   :  { %881 = vst [vmem:[#allocation2 + $0x148] sm:$0xff] %v817_v50  ;;  %v822_v56 = vadd.f32 %v1443_v39, %v751_v51  ;;  %v749_v57 = vmul.f32 %v1438_v37, %v619_v55  ;;  %v1036_v58 = vpop.f32.mrf.mxu0 }
  0xe5   :  { %854 = vst [vmem:[#allocation2 + $0x70] sm:$0xff] %v790_v53  ;;  %v788_v59 = vadd.f32 %v1443_v39, %v717_v54  ;;  %v720_v60 = vmul.f32 %v1036_v58, %v1438_v37  ;;  %v1068_v61 = vpop.f32.mrf.mxu1 }
  0xe6   :  { %886 = vst [vmem:[#allocation2 + $0x170] sm:$0xff] %v822_v56  ;;  %v820_v62 = vadd.f32 %v1443_v39, %v749_v57  ;;  %v752_v63 = vmul.f32 %v1068_v61, %v1438_v37  ;;  %v494_v0 = vpop.f32.mrf.mxu0 }
  0xe7   :  { %852 = vst [vmem:[#allocation2 + $0x60] sm:$0xff] %v788_v59  ;;  %v791_v1 = vadd.f32 %v1443_v39, %v720_v60  ;;  %v718_v2 = vmul.f32 %v1438_v37, %v494_v0  ;;  %v622_v3 = vpop.f32.mrf.mxu1 }
  0xe8   :  { %884 = vst [vmem:[#allocation2 + $0x160] sm:$0xff] %v820_v62  ;;  %v823_v5 = vadd.f32 %v1443_v39, %v752_v63  ;;  %v750_v6 = vmul.f32 %v1438_v37, %v622_v3  ;;  %v1039_v7 = vpop.f32.mrf.mxu0 }
  0xe9   :  { %855 = vst [vmem:[#allocation2 + $0x78] sm:$0xff] %v791_v1  ;;  %v789_v8 = vadd.f32 %v1443_v39, %v718_v2  ;;  %v723_v9 = vmul.f32 %v1039_v7, %v1438_v37  ;;  %v1071_v10 = vpop.f32.mrf.mxu1 }
  0xea   :  { %887 = vst [vmem:[#allocation2 + $0x178] sm:$0xff] %v823_v5  ;;  %v821_v11 = vadd.f32 %v1443_v39, %v750_v6  ;;  %v755_v12 = vmul.f32 %v1071_v10, %v1438_v37  ;;  %v507_v13 = vpop.f32.mrf.mxu0 }
  0xeb   :  { %853 = vst [vmem:[#allocation2 + $0x68] sm:$0xff] %v789_v8  ;;  %v794_v14 = vadd.f32 %v1443_v39, %v723_v9  ;;  %v721_v15 = vmul.f32 %v1438_v37, %v507_v13  ;;  %v635_v16 = vpop.f32.mrf.mxu1 }
  0xec   :  { %885 = vst [vmem:[#allocation2 + $0x168] sm:$0xff] %v821_v11  ;;  %v826_v17 = vadd.f32 %v1443_v39, %v755_v12  ;;  %v753_v18 = vmul.f32 %v1438_v37, %v635_v16  ;;  %v1040_v19 = vpop.f32.mrf.mxu0 }
  0xed   :  { %858 = vst [vmem:[#allocation2 + $0x90] sm:$0xff] %v794_v14  ;;  %v792_v20 = vadd.f32 %v1443_v39, %v721_v15  ;;  %v724_v21 = vmul.f32 %v1040_v19, %v1438_v37  ;;  %v1072_v22 = vpop.f32.mrf.mxu1 }
  0xee   :  { %890 = vst [vmem:[#allocation2 + $0x190] sm:$0xff] %v826_v17  ;;  %v824_v23 = vadd.f32 %v1443_v39, %v753_v18  ;;  %v756_v24 = vmul.f32 %v1072_v22, %v1438_v37  ;;  %v510_v25 = vpop.f32.mrf.mxu0 }
  0xef   :  { %856 = vst [vmem:[#allocation2 + $0x80] sm:$0xff] %v792_v20  ;;  %v795_v26 = vadd.f32 %v1443_v39, %v724_v21  ;;  %v722_v27 = vmul.f32 %v1438_v37, %v510_v25  ;;  %v638_v28 = vpop.f32.mrf.mxu1 }
  0xf0   :  { %888 = vst [vmem:[#allocation2 + $0x180] sm:$0xff] %v824_v23  ;;  %v827_v29 = vadd.f32 %v1443_v39, %v756_v24  ;;  %v754_v30 = vmul.f32 %v1438_v37, %v638_v28  ;;  %v1043_v31 = vpop.f32.mrf.mxu0 }
  0xf1   :  { %859 = vst [vmem:[#allocation2 + $0x98] sm:$0xff] %v795_v26  ;;  %v793_v32 = vadd.f32 %v1443_v39, %v722_v27  ;;  %v727_v33 = vmul.f32 %v1043_v31, %v1438_v37  ;;  %v1075_v34 = vpop.f32.mrf.mxu1 }
  0xf2   :  { %891 = vst [vmem:[#allocation2 + $0x198] sm:$0xff] %v827_v29  ;;  %v825_v35 = vadd.f32 %v1443_v39, %v754_v30  ;;  %v759_v36 = vmul.f32 %v1075_v34, %v1438_v37  ;;  %v523_v38 = vpop.f32.mrf.mxu0 }
  0xf3   :  { %857 = vst [vmem:[#allocation2 + $0x88] sm:$0xff] %v793_v32  ;;  %v798_v4 = vadd.f32 %v1443_v39, %v727_v33  ;;  %v725_v40 = vmul.f32 %v1438_v37, %v523_v38  ;;  %v651_v41 = vpop.f32.mrf.mxu1 }
  0xf4   :  { %889 = vst [vmem:[#allocation2 + $0x188] sm:$0xff] %v825_v35  ;;  %v830_v42 = vadd.f32 %v1443_v39, %v759_v36  ;;  %v757_v43 = vmul.f32 %v1438_v37, %v651_v41  ;;  %v1044_v44 = vpop.f32.mrf.mxu0 }
  0xf5   :  { %862 = vst [vmem:[#allocation2 + $0xb0] sm:$0xff] %v798_v4  ;;  %v796_v45 = vadd.f32 %v1443_v39, %v725_v40  ;;  %v728_v46 = vmul.f32 %v1044_v44, %v1438_v37  ;;  %v1076_v47 = vpop.f32.mrf.mxu1 }
  0xf6   :  { %894 = vst [vmem:[#allocation2 + $0x1b0] sm:$0xff] %v830_v42  ;;  %v828_v48 = vadd.f32 %v1443_v39, %v757_v43  ;;  %v760_v49 = vmul.f32 %v1076_v47, %v1438_v37  ;;  %v526_v50 = vpop.f32.mrf.mxu0 }
  0xf7   :  { %860 = vst [vmem:[#allocation2 + $0xa0] sm:$0xff] %v796_v45  ;;  %v799_v51 = vadd.f32 %v1443_v39, %v728_v46  ;;  %v726_v52 = vmul.f32 %v1438_v37, %v526_v50  ;;  %v654_v53 = vpop.f32.mrf.mxu1 }
  0xf8   :  { %892 = vst [vmem:[#allocation2 + $0x1a0] sm:$0xff] %v828_v48  ;;  %v831_v54 = vadd.f32 %v1443_v39, %v760_v49  ;;  %v758_v55 = vmul.f32 %v1438_v37, %v654_v53  ;;  %v1047_v56 = vpop.f32.mrf.mxu0 }
  0xf9   :  { %863 = vst [vmem:[#allocation2 + $0xb8] sm:$0xff] %v799_v51  ;;  %v797_v57 = vadd.f32 %v1443_v39, %v726_v52  ;;  %v731_v58 = vmul.f32 %v1047_v56, %v1438_v37  ;;  %v1079_v59 = vpop.f32.mrf.mxu1 }
  0xfa   :  { %895 = vst [vmem:[#allocation2 + $0x1b8] sm:$0xff] %v831_v54  ;;  %v829_v60 = vadd.f32 %v1443_v39, %v758_v55  ;;  %v763_v61 = vmul.f32 %v1079_v59, %v1438_v37  ;;  %v539_v62 = vpop.f32.mrf.mxu0 }
  0xfb   :  { %861 = vst [vmem:[#allocation2 + $0xa8] sm:$0xff] %v797_v57  ;;  %v802_v63 = vadd.f32 %v1443_v39, %v731_v58  ;;  %v729_v0 = vmul.f32 %v1438_v37, %v539_v62  ;;  %v667_v1 = vpop.f32.mrf.mxu1 }
  0xfc   :  { %893 = vst [vmem:[#allocation2 + $0x1a8] sm:$0xff] %v829_v60  ;;  %v834_v2 = vadd.f32 %v1443_v39, %v763_v61  ;;  %v761_v3 = vmul.f32 %v1438_v37, %v667_v1  ;;  %v1048_v5 = vpop.f32.mrf.mxu0 }
  0xfd   :  { %866 = vst [vmem:[#allocation2 + $0xd0] sm:$0xff] %v802_v63  ;;  %v800_v6 = vadd.f32 %v1443_v39, %v729_v0  ;;  %v732_v7 = vmul.f32 %v1048_v5, %v1438_v37  ;;  %v1080_v8 = vpop.f32.mrf.mxu1 }
  0xfe   :  { %898 = vst [vmem:[#allocation2 + $0x1d0] sm:$0xff] %v834_v2  ;;  %v832_v9 = vadd.f32 %v1443_v39, %v761_v3  ;;  %v764_v10 = vmul.f32 %v1080_v8, %v1438_v37  ;;  %v542_v11 = vpop.f32.mrf.mxu0 }
  0xff   :  { %864 = vst [vmem:[#allocation2 + $0xc0] sm:$0xff] %v800_v6  ;;  %v803_v12 = vadd.f32 %v1443_v39, %v732_v7  ;;  %v730_v13 = vmul.f32 %v1438_v37, %v542_v11  ;;  %v670_v14 = vpop.f32.mrf.mxu1 }
 0x100   :  { %896 = vst [vmem:[#allocation2 + $0x1c0] sm:$0xff] %v832_v9  ;;  %v835_v15 = vadd.f32 %v1443_v39, %v764_v10  ;;  %v762_v16 = vmul.f32 %v1438_v37, %v670_v14  ;;  %v1051_v17 = vpop.f32.mrf.mxu0 }
 0x101   :  { %867 = vst [vmem:[#allocation2 + $0xd8] sm:$0xff] %v803_v12  ;;  %v801_v18 = vadd.f32 %v1443_v39, %v730_v13  ;;  %v735_v19 = vmul.f32 %v1051_v17, %v1438_v37  ;;  %v1083_v20 = vpop.f32.mrf.mxu1 }
 0x102   :  { %899 = vst [vmem:[#allocation2 + $0x1d8] sm:$0xff] %v835_v15  ;;  %v833_v21 = vadd.f32 %v1443_v39, %v762_v16  ;;  %v767_v22 = vmul.f32 %v1083_v20, %v1438_v37  ;;  %v555_v23 = vpop.f32.mrf.mxu0 }
 0x103   :  { %865 = vst [vmem:[#allocation2 + $0xc8] sm:$0xff] %v801_v18  ;;  %v806_v24 = vadd.f32 %v1443_v39, %v735_v19  ;;  %v733_v25 = vmul.f32 %v1438_v37, %v555_v23  ;;  %v683_v26 = vpop.f32.mrf.mxu1 }
 0x104   :  { %897 = vst [vmem:[#allocation2 + $0x1c8] sm:$0xff] %v833_v21  ;;  %v838_v27 = vadd.f32 %v1443_v39, %v767_v22  ;;  %v765_v28 = vmul.f32 %v1438_v37, %v683_v26  ;;  %v1052_v29 = vpop.f32.mrf.mxu0 }
 0x105   :  { %870 = vst [vmem:[#allocation2 + $0xf0] sm:$0xff] %v806_v24  ;;  %v804_v30 = vadd.f32 %v1443_v39, %v733_v25  ;;  %v736_v31 = vmul.f32 %v1052_v29, %v1438_v37  ;;  %v1084_v32 = vpop.f32.mrf.mxu1 }
 0x106   :  { %902 = vst [vmem:[#allocation2 + $0x1f0] sm:$0xff] %v838_v27  ;;  %v836_v33 = vadd.f32 %v1443_v39, %v765_v28  ;;  %v768_v34 = vmul.f32 %v1084_v32, %v1438_v37  ;;  %v558_v35 = vpop.f32.mrf.mxu0 }
 0x107   :  { %868 = vst [vmem:[#allocation2 + $0xe0] sm:$0xff] %v804_v30  ;;  %v807_v36 = vadd.f32 %v1443_v39, %v736_v31  ;;  %v734_v38 = vmul.f32 %v1438_v37, %v558_v35  ;;  %v686_v4 = vpop.f32.mrf.mxu1 }
 0x108   :  { %900 = vst [vmem:[#allocation2 + $0x1e0] sm:$0xff] %v836_v33  ;;  %v839_v40 = vadd.f32 %v1443_v39, %v768_v34  ;;  %v766_v41 = vmul.f32 %v1438_v37, %v686_v4 }
 0x109   :  { %871 = vst [vmem:[#allocation2 + $0xf8] sm:$0xff] %v807_v36  ;;  %v805_v42 = vadd.f32 %v1443_v39, %v734_v38 }
 0x10a   :  { %903 = vst [vmem:[#allocation2 + $0x1f8] sm:$0xff] %v839_v40  ;;  %v837_v43 = vadd.f32 %v1443_v39, %v766_v41 }
 0x10b   :  { %869 = vst [vmem:[#allocation2 + $0xe8] sm:$0xff] %v805_v42 }
 0x10c   :  { %901 = vst [vmem:[#allocation2 + $0x1e8] sm:$0xff] %v837_v43 }
 0x10d   :  { %1104 = shalt.err (!%p1101_p4)
}
 0x10e   :  { %s1117_s14 = smov 128   ;;  %s1118_s15 = smov 8  }
 0x10f   :  { %915 = dma.vmem_to_hbm [thread:$0]  %s910_s3, 8192, %s1580_s4, [#allocation3], %s1117_s14, %s1117_s14, %s1118_s15  }
 0x110   :  { %1113 = dma.done.wait [#allocation3], 8192  }
 0x111   :  { %1114 = vsyncadd [#allocation3], 4294959104 }
 0x112   :  { %919 = vsyncpa [#allocation3], 1 }

// kernel: relu_conv_bn_forward.2
= control target key start
LH: loop header
LB: loop body
LE: loop exit
PB: predicated region body
PF: predicated region fallthrough
CT: control target
= control target key end

     0   :  { %vm400_vm0 = vcmask 1041408   ;;  %v1073_v4 = vmov 0   ;;  %vm303_vm1 = vcmask 31744   ;;  %s1480_s1 = inlined_call_operand.vmem [shape: bf16[4,128], index: 1, kind: input, shape index: {}]   ;;  %s1481_s0 = inlined_call_operand.vmem [shape: bf16[512,4], index: 0, kind: input, shape index: {}]   ;;  %s1482_s2 = inlined_call_operand.vmem [shape: f32[1,8,128], index: 2, kind: output, shape index: {0}]   ;;  %s1483_s3 = inlined_call_operand.vmem [shape: f32[1,8,128], index: 3, kind: output, shape index: {1}]  }
   0x1   :  { %v142_v0 = vld [vmem:[%s1480_s1] sm:$0x3]  ;;  %v15_v2 = vld [vmem:[%s1481_s0 + $0x4] sm:$0xf]  ;;  %v16_v7 = vld [vmem:[%s1481_s0 + $0x8] sm:$0xf] }
   0x2   :  { %v14_v1 = vld [vmem:[%s1481_s0] sm:$0xf]  ;;  %1070 = vmatprep.subr.msk.bf16.mxu0 %vm400_vm0, %v142_v0  ;;  %v402_v3 = vsel %vm400_vm0, %v142_v0, 0  ;;  %v79_v6 = vmax.bf16 %v1073_v4, %v15_v2  ;;  %v17_v8 = vld [vmem:[%s1481_s0 + $0xc] sm:$0xf]  ;;  %1071 = vmatprep.subr.msk.bf16.mxu1 %vm400_vm0, %v142_v0  ;;  %v80_v9 = vmax.bf16 %v1073_v4, %v16_v7 }
   0x3   :  { %v78_v5 = vmax.bf16 %v1073_v4, %v14_v1  ;;  %1003 = vmatpush3.bf16.msra.mxu0 %v402_v3  ;;  %v81_v10 = vmax.bf16 %v1073_v4, %v17_v8  ;;  %v18_v11 = vld [vmem:[%s1481_s0 + $0x10] sm:$0xf]  ;;  %v19_v12 = vld [vmem:[%s1481_s0 + $0x14] sm:$0xf]  ;;  %1069 = vmatpush3.bf16.msra.mxu1 %v402_v3  ;;  %v20_v16 = vld [vmem:[%s1481_s0 + $0x18] sm:$0xf] }
   0x4   :  { %v82_v14 = vmax.bf16 %v1073_v4, %v18_v11  ;;  %v83_v15 = vmax.bf16 %v1073_v4, %v19_v12  ;;  %v21_v17 = vld [vmem:[%s1481_s0 + $0x1c] sm:$0xf]  ;;  %v22_v19 = vld [vmem:[%s1481_s0 + $0x20] sm:$0xf]  ;;  %v23_v20 = vld [vmem:[%s1481_s0 + $0x24] sm:$0xf]  ;;  %v84_v22 = vmax.bf16 %v1073_v4, %v20_v16 }
   0x5   :  { %v905_v13 = vcombine.low %v78_v5, %v79_v6  ;;  %v906_v18 = vcombine.low %v80_v9, %v81_v10  ;;  %v85_v23 = vmax.bf16 %v1073_v4, %v21_v17  ;;  %v86_v24 = vmax.bf16 %v1073_v4, %v22_v19  ;;  %v24_v27 = vld [vmem:[%s1481_s0 + $0x28] sm:$0xf]  ;;  %v25_v28 = vld [vmem:[%s1481_s0 + $0x2c] sm:$0xf]  ;;  %v26_v29 = vld [vmem:[%s1481_s0 + $0x30] sm:$0xf] }
   0x6   :  { %v907_v21 = vcombine.low %v82_v14, %v83_v15  ;;  %v87_v25 = vmax.bf16 %v1073_v4, %v23_v20  ;;  %v27_v31 = vld [vmem:[%s1481_s0 + $0x34] sm:$0xf]  ;;  %v46_v32 = vld [vmem:[%s1481_s0 + $0x80] sm:$0xf]  ;;  %v47_v33 = vld [vmem:[%s1481_s0 + $0x84] sm:$0xf]  ;;  %v88_v37 = vmax.bf16 %v1073_v4, %v24_v27  ;;  %v89_v41 = vmax.bf16 %v1073_v4, %v25_v28 }
   0x7   :  { %1004 = vmatprep.mubr.msk.bf16.mxu0 %vm303_vm1, %v905_v13  ;;  %v908_v26 = vcombine.low %v84_v22, %v85_v23  ;;  %v48_v34 = vld [vmem:[%s1481_s0 + $0x88] sm:$0xf]  ;;  %v49_v35 = vld [vmem:[%s1481_s0 + $0x8c] sm:$0xf]  ;;  %v50_v36 = vld [vmem:[%s1481_s0 + $0x90] sm:$0xf]  ;;  %v110_v38 = vmax.bf16 %v1073_v4, %v46_v32  ;;  %v111_v39 = vmax.bf16 %v1073_v4, %v47_v33  ;;  %v90_v45 = vmax.bf16 %v1073_v4, %v26_v29 }
   0x8   :  { %1005 = vmatmul.mubr.msk.bf16.vlgmr.msra.gmra.mxu0 %vm303_vm1, %v906_v18  ;;  %v909_v30 = vcombine.low %v86_v24, %v87_v25  ;;  %v51_v40 = vld [vmem:[%s1481_s0 + $0x94] sm:$0xf]  ;;  %v112_v42 = vmax.bf16 %v1073_v4, %v48_v34  ;;  %v113_v43 = vmax.bf16 %v1073_v4, %v49_v35  ;;  %v114_v44 = vmax.bf16 %v1073_v4, %v50_v36  ;;  %v52_v49 = vld [vmem:[%s1481_s0 + $0x98] sm:$0xf]  ;;  %v53_v50 = vld [vmem:[%s1481_s0 + $0x9c] sm:$0xf] }
   0x9   :  { %1008 = vmatprep.mubr.msk.bf16.mxu0 %vm303_vm1, %v907_v21  ;;  %v91_v46 = vmax.bf16 %v1073_v4, %v27_v31  ;;  %v921_v47 = vcombine.low %v110_v38, %v111_v39  ;;  %v115_v48 = vmax.bf16 %v1073_v4, %v51_v40  ;;  %v54_v52 = vld [vmem:[%s1481_s0 + $0xa0] sm:$0xf]  ;;  %v55_v53 = vld [vmem:[%s1481_s0 + $0xa4] sm:$0xf]  ;;  %v910_v55 = vcombine.low %v88_v37, %v89_v41  ;;  %v28_v59 = vld [vmem:[%s1481_s0 + $0x38] sm:$0xf] }
   0xa   :  { %v922_v51 = vcombine.low %v112_v42, %v113_v43  ;;  %v116_v56 = vmax.bf16 %v1073_v4, %v52_v49  ;;  %v117_v57 = vmax.bf16 %v1073_v4, %v53_v50  ;;  %v29_v60 = vld [vmem:[%s1481_s0 + $0x3c] sm:$0xf]  ;;  %v118_v61 = vmax.bf16 %v1073_v4, %v54_v52  ;;  %v30_v63 = vld [vmem:[%s1481_s0 + $0x40] sm:$0xf]  ;;  %v31_v0 = vld [vmem:[%s1481_s0 + $0x44] sm:$0xf] }
   0xb   :  { %1036 = vmatprep.mubr.msk.bf16.mxu1 %vm303_vm1, %v921_v47  ;;  %v923_v54 = vcombine.low %v114_v44, %v115_v48  ;;  %v911_v58 = vcombine.low %v90_v45, %v91_v46  ;;  %v119_v62 = vmax.bf16 %v1073_v4, %v55_v53  ;;  %v76_v1 = vld [vmem:[%s1481_s0 + $0xf8] sm:$0xf]  ;;  %v92_v2 = vmax.bf16 %v1073_v4, %v28_v59  ;;  %v77_v6 = vld [vmem:[%s1481_s0 + $0xfc] sm:$0xf]  ;;  %v56_v10 = vld [vmem:[%s1481_s0 + $0xa8] sm:$0xf] }
   0xc   :  { %1037 = vmatmul.mubr.msk.bf16.vlgmr.msra.gmra.mxu1 %vm303_vm1, %v922_v51  ;;  %v93_v3 = vmax.bf16 %v1073_v4, %v29_v60  ;;  %v924_v5 = vcombine.low %v116_v56, %v117_v57  ;;  %v94_v7 = vmax.bf16 %v1073_v4, %v30_v63  ;;  %v95_v8 = vmax.bf16 %v1073_v4, %v31_v0  ;;  %v57_v11 = vld [vmem:[%s1481_s0 + $0xac] sm:$0xf]  ;;  %v58_v12 = vld [vmem:[%s1481_s0 + $0xb0] sm:$0xf]  ;;  %v59_v13 = vld [vmem:[%s1481_s0 + $0xb4] sm:$0xf] }
   0xd   :  { %1040 = vmatprep.mubr.msk.bf16.mxu1 %vm303_vm1, %v923_v54  ;;  %v925_v9 = vcombine.low %v118_v61, %v119_v62  ;;  %v1238_v14 = vmax.bf16 %v1073_v4, %v76_v1  ;;  %v1241_v15 = vmax.bf16 %v1073_v4, %v77_v6  ;;  %v120_v17 = vmax.bf16 %v1073_v4, %v56_v10  ;;  %v32_v20 = vld [vmem:[%s1481_s0 + $0x48] sm:$0xf]  ;;  %v33_v21 = vld [vmem:[%s1481_s0 + $0x4c] sm:$0xf]  ;;  %v34_v25 = vld [vmem:[%s1481_s0 + $0x50] sm:$0xf] }
   0xe   :  { %v912_v16 = vcombine.low %v92_v2, %v93_v3  ;;  %v121_v18 = vmax.bf16 %v1073_v4, %v57_v11  ;;  %v913_v19 = vcombine.low %v94_v7, %v95_v8  ;;  %v122_v22 = vmax.bf16 %v1073_v4, %v58_v12  ;;  %v60_v33 = vld [vmem:[%s1481_s0 + $0xb8] sm:$0xf]  ;;  %v61_v34 = vld [vmem:[%s1481_s0 + $0xbc] sm:$0xf]  ;;  %v62_v35 = vld [vmem:[%s1481_s0 + $0xc0] sm:$0xf] }
   0xf   :  { %v123_v23 = vmax.bf16 %v1073_v4, %v59_v13  ;;  %v936_v24 = vcombine.low %v1238_v14, %v1241_v15  ;;  %v96_v27 = vmax.bf16 %v1073_v4, %v32_v20  ;;  %v97_v28 = vmax.bf16 %v1073_v4, %v33_v21  ;;  %v63_v36 = vld [vmem:[%s1481_s0 + $0xc4] sm:$0xf]  ;;  %v36_v41 = vld [vmem:[%s1481_s0 + $0x58] sm:$0xf]  ;;  %v37_v42 = vld [vmem:[%s1481_s0 + $0x5c] sm:$0xf] }
  0x10   :  { %1009 = vmatmul.mubr.msk.bf16.gmra.mxu0 %vm303_vm1, %v908_v26  ;;  %v35_v26 = vld [vmem:[%s1481_s0 + $0x54] sm:$0xf]  ;;  %v926_v29 = vcombine.low %v120_v17, %v121_v18  ;;  %v124_v38 = vmax.bf16 %v1073_v4, %v60_v33  ;;  %v125_v39 = vmax.bf16 %v1073_v4, %v61_v34  ;;  %v126_v43 = vmax.bf16 %v1073_v4, %v62_v35  ;;  %v38_v45 = vld [vmem:[%s1481_s0 + $0x60] sm:$0xf]  ;;  %v39_v46 = vld [vmem:[%s1481_s0 + $0x64] sm:$0xf] }
  0x11   :  { %1012 = vmatprep.mubr.msk.bf16.mxu0 %vm303_vm1, %v909_v30  ;;  %v98_v30 = vmax.bf16 %v1073_v4, %v34_v25  ;;  %v99_v31 = vmax.bf16 %v1073_v4, %v35_v26  ;;  %v927_v32 = vcombine.low %v122_v22, %v123_v23  ;;  %v914_v37 = vcombine.low %v96_v27, %v97_v28  ;;  %v64_v53 = vld [vmem:[%s1481_s0 + $0xc8] sm:$0xf]  ;;  %v65_v54 = vld [vmem:[%s1481_s0 + $0xcc] sm:$0xf]  ;;  %v67_v56 = vld [vmem:[%s1481_s0 + $0xd4] sm:$0xf] }
  0x12   :  { %v127_v44 = vmax.bf16 %v1073_v4, %v63_v36  ;;  %v100_v47 = vmax.bf16 %v1073_v4, %v36_v41  ;;  %v101_v48 = vmax.bf16 %v1073_v4, %v37_v42  ;;  %v928_v49 = vcombine.low %v124_v38, %v125_v39  ;;  %v40_v61 = vld [vmem:[%s1481_s0 + $0x68] sm:$0xf]  ;;  %v41_v62 = vld [vmem:[%s1481_s0 + $0x6c] sm:$0xf]  ;;  %v42_v1 = vld [vmem:[%s1481_s0 + $0x70] sm:$0xf] }
  0x13   :  { %v915_v40 = vcombine.low %v98_v30, %v99_v31  ;;  %v102_v50 = vmax.bf16 %v1073_v4, %v38_v45  ;;  %v103_v51 = vmax.bf16 %v1073_v4, %v39_v46  ;;  %v129_v59 = vmax.bf16 %v1073_v4, %v65_v54  ;;  %v43_v2 = vld [vmem:[%s1481_s0 + $0x74] sm:$0xf]  ;;  %v68_v10 = vld [vmem:[%s1481_s0 + $0xd8] sm:$0xf]  ;;  %v69_v11 = vld [vmem:[%s1481_s0 + $0xdc] sm:$0xf] }
  0x14   :  { %1041 = vmatmul.mubr.msk.bf16.gmra.mxu1 %vm303_vm1, %v924_v5  ;;  %v929_v52 = vcombine.low %v126_v43, %v127_v44  ;;  %v916_v57 = vcombine.low %v100_v47, %v101_v48  ;;  %v131_v0 = vmax.bf16 %v1073_v4, %v67_v56  ;;  %v104_v3 = vmax.bf16 %v1073_v4, %v40_v61  ;;  %v70_v12 = vld [vmem:[%s1481_s0 + $0xe0] sm:$0xf]  ;;  %v71_v13 = vld [vmem:[%s1481_s0 + $0xe4] sm:$0xf]  ;;  %v44_v20 = vld [vmem:[%s1481_s0 + $0x78] sm:$0xf] }
  0x15   :  { %1044 = vmatprep.mubr.msk.bf16.mxu1 %vm303_vm1, %v925_v9  ;;  %v917_v60 = vcombine.low %v102_v50, %v103_v51  ;;  %v105_v5 = vmax.bf16 %v1073_v4, %v41_v62  ;;  %v106_v7 = vmax.bf16 %v1073_v4, %v42_v1  ;;  %v107_v8 = vmax.bf16 %v1073_v4, %v43_v2  ;;  %v45_v21 = vld [vmem:[%s1481_s0 + $0x7c] sm:$0xf]  ;;  %v73_v30 = vld [vmem:[%s1481_s0 + $0xec] sm:$0xf]  ;;  %v74_v31 = vld [vmem:[%s1481_s0 + $0xf0] sm:$0xf] }
  0x16   :  { %v132_v17 = vmax.bf16 %v1073_v4, %v68_v10  ;;  %v133_v18 = vmax.bf16 %v1073_v4, %v69_v11  ;;  %v134_v22 = vmax.bf16 %v1073_v4, %v70_v12  ;;  %v135_v23 = vmax.bf16 %v1073_v4, %v71_v13 }
  0x17   :  { %v108_v25 = vmax.bf16 %v1073_v4, %v44_v20  ;;  %v109_v26 = vmax.bf16 %v1073_v4, %v45_v21  ;;  %v137_v35 = vmax.bf16 %v1073_v4, %v73_v30  ;;  %v138_v36 = vmax.bf16 %v1073_v4, %v74_v31 }
  0x18   :  { %1013 = vmatmul.mubr.msk.bf16.gmra.mxu0 %vm303_vm1, %v910_v55  ;;  %v66_v55 = vld [vmem:[%s1481_s0 + $0xd0] sm:$0xf]  ;;  %v932_v27 = vcombine.low %v132_v17, %v133_v18  ;;  %v933_v28 = vcombine.low %v134_v22, %v135_v23 }
  0x19   :  { %1016 = vmatprep.mubr.msk.bf16.mxu0 %vm303_vm1, %v911_v58  ;;  %v128_v58 = vmax.bf16 %v1073_v4, %v64_v53  ;;  %v130_v63 = vmax.bf16 %v1073_v4, %v66_v55  ;;  %v920_v33 = vcombine.low %v108_v25, %v109_v26 }
  0x1b   :  { %v930_v6 = vcombine.low %v128_v58, %v129_v59  ;;  %v931_v9 = vcombine.low %v130_v63, %v131_v0 }
  0x1c   :  { %1045 = vmatmul.mubr.msk.bf16.gmra.mxu1 %vm303_vm1, %v926_v29  ;;  %v72_v29 = vld [vmem:[%s1481_s0 + $0xe8] sm:$0xf] }
  0x1d   :  { %1048 = vmatprep.mubr.msk.bf16.mxu1 %vm303_vm1, %v927_v32  ;;  %v75_v32 = vld [vmem:[%s1481_s0 + $0xf4] sm:$0xf]  ;;  %v136_v34 = vmax.bf16 %v1073_v4, %v72_v29 }
  0x1f   :  { %v934_v38 = vcombine.low %v136_v34, %v137_v35 }
  0x20   :  { %1017 = vmatmul.mubr.msk.bf16.gmra.mxu0 %vm303_vm1, %v912_v16  ;;  %v918_v16 = vcombine.low %v104_v3, %v105_v5 }
  0x21   :  { %1020 = vmatprep.mubr.msk.bf16.mxu0 %vm303_vm1, %v913_v19  ;;  %v919_v19 = vcombine.low %v106_v7, %v107_v8 }
  0x24   :  { %1049 = vmatmul.mubr.msk.bf16.gmra.mxu1 %vm303_vm1, %v928_v49 }
  0x25   :  { %1052 = vmatprep.mubr.msk.bf16.mxu1 %vm303_vm1, %v929_v52 }
  0x28   :  { %1021 = vmatmul.mubr.msk.bf16.gmra.mxu0 %vm303_vm1, %v914_v37  ;;  %v139_v37 = vmax.bf16 %v1073_v4, %v75_v32 }
  0x29   :  { %1024 = vmatprep.mubr.msk.bf16.mxu0 %vm303_vm1, %v915_v40 }
  0x2a   :  { %v935_v39 = vcombine.low %v138_v36, %v139_v37 }
  0x2c   :  { %1053 = vmatmul.mubr.msk.bf16.gmra.mxu1 %vm303_vm1, %v930_v6 }
  0x2d   :  { %1056 = vmatprep.mubr.msk.bf16.mxu1 %vm303_vm1, %v931_v9 }
  0x30   :  { %1025 = vmatmul.mubr.msk.bf16.gmra.mxu0 %vm303_vm1, %v916_v57 }
  0x31   :  { %1028 = vmatprep.mubr.msk.bf16.mxu0 %vm303_vm1, %v917_v60 }
  0x34   :  { %1057 = vmatmul.mubr.msk.bf16.gmra.mxu1 %vm303_vm1, %v932_v27 }
  0x35   :  { %1060 = vmatprep.mubr.msk.bf16.mxu1 %vm303_vm1, %v933_v28 }
  0x38   :  { %1029 = vmatmul.mubr.msk.bf16.gmra.mxu0 %vm303_vm1, %v918_v16 }
  0x39   :  { %1032 = vmatprep.mubr.msk.bf16.mxu0 %vm303_vm1, %v919_v19 }
  0x3c   :  { %1061 = vmatmul.mubr.msk.bf16.gmra.mxu1 %vm303_vm1, %v934_v38 }
  0x3d   :  { %1064 = vmatprep.mubr.msk.bf16.mxu1 %vm303_vm1, %v935_v39 }
  0x40   :  { %1033 = vmatmul.mubr.msk.bf16.gmra.mxu0 %vm303_vm1, %v920_v33 }
  0x44   :  { %1065 = vmatmul.mubr.msk.bf16.gmra.mxu1 %vm303_vm1, %v936_v24 }
  0xc8   :  { %v1006_v40 = vpop.f32.mrf.mxu0 }
  0xc9   :  { %v764_v47 = vmul.f32 %v1006_v40, %v1006_v40 }
  0xca   :  { %v438_v41 = vpop.f32.mrf.mxu0 }
  0xcb   :  { %v762_v44 = vmul.f32 %v438_v41, %v438_v41 }
  0xcc   :  { %v1007_v42 = vpop.f32.mrf.mxu0  ;;  %v1394_v55 = vpop.f32.mrf.mxu1 }
  0xcd   :  { %v765_v51 = vmul.f32 %v1007_v42, %v1007_v42 }
  0xce   :  { %v441_v43 = vpop.f32.mrf.mxu0  ;;  %v1396_v57 = vpop.f32.mrf.mxu1 }
  0xcf   :  { %v693_v45 = vadd.f32 %v441_v43, %v438_v41  ;;  %v763_v4 = vmul.f32 %v441_v43, %v441_v43 }
  0xd0   :  { %v1010_v46 = vpop.f32.mrf.mxu0  ;;  %v1398_v62 = vpop.f32.mrf.mxu1 }
  0xd1   :  { %v694_v48 = vadd.f32 %v1006_v40, %v693_v45  ;;  %v826_v49 = vadd.f32 %v763_v4, %v762_v44  ;;  %v768_v63 = vmul.f32 %v1010_v46, %v1010_v46 }
  0xd2   :  { %v454_v50 = vpop.f32.mrf.mxu0  ;;  %v1400_v3 = vpop.f32.mrf.mxu1 }
  0xd3   :  { %v827_v52 = vadd.f32 %v826_v49, %v764_v47  ;;  %v695_v53 = vadd.f32 %v1007_v42, %v694_v48  ;;  %v766_v15 = vmul.f32 %v454_v50, %v454_v50 }
  0xd4   :  { %v1011_v54 = vpop.f32.mrf.mxu0  ;;  %v1402_v9 = vpop.f32.mrf.mxu1 }
  0xd5   :  { %v696_v14 = vadd.f32 %v695_v53, %v454_v50  ;;  %v828_v24 = vadd.f32 %v827_v52, %v765_v51  ;;  %v769_v5 = vmul.f32 %v1011_v54, %v1011_v54 }
  0xd6   :  { %v457_v56 = vpop.f32.mrf.mxu0  ;;  %v1404_v16 = vpop.f32.mrf.mxu1 }
  0xd7   :  { %v829_v58 = vadd.f32 %v828_v24, %v766_v15  ;;  %v697_v59 = vadd.f32 %v696_v14, %v457_v56  ;;  %v767_v60 = vmul.f32 %v457_v56, %v457_v56 }
  0xd8   :  { %v1014_v61 = vpop.f32.mrf.mxu0  ;;  %v1406_v21 = vpop.f32.mrf.mxu1 }
  0xd9   :  { %v698_v0 = vadd.f32 %v1010_v46, %v697_v59  ;;  %v830_v1 = vadd.f32 %v829_v58, %v767_v60  ;;  %v772_v22 = vmul.f32 %v1014_v61, %v1014_v61 }
  0xda   :  { %v470_v2 = vpop.f32.mrf.mxu0  ;;  %v1408_v31 = vpop.f32.mrf.mxu1 }
  0xdb   :  { %v831_v6 = vadd.f32 %v830_v1, %v768_v63  ;;  %v699_v7 = vadd.f32 %v1011_v54, %v698_v0  ;;  %v770_v11 = vmul.f32 %v470_v2, %v470_v2 }
  0xdc   :  { %v1015_v8 = vpop.f32.mrf.mxu0  ;;  %v1410_v40 = vpop.f32.mrf.mxu1 }
  0xdd   :  { %v700_v10 = vadd.f32 %v699_v7, %v470_v2  ;;  %v832_v12 = vadd.f32 %v831_v6, %v769_v5  ;;  %v773_v27 = vmul.f32 %v1015_v8, %v1015_v8 }
  0xde   :  { %v473_v13 = vpop.f32.mrf.mxu0  ;;  %v1412_v48 = vpop.f32.mrf.mxu1 }
  0xdf   :  { %v833_v17 = vadd.f32 %v832_v12, %v770_v11  ;;  %v701_v18 = vadd.f32 %v700_v10, %v473_v13  ;;  %v771_v19 = vmul.f32 %v473_v13, %v473_v13 }
  0xe0   :  { %v1018_v20 = vpop.f32.mrf.mxu0  ;;  %v1414_v24 = vpop.f32.mrf.mxu1 }
  0xe1   :  { %v702_v23 = vadd.f32 %v1014_v61, %v701_v18  ;;  %v834_v25 = vadd.f32 %v833_v17, %v771_v19  ;;  %v776_v41 = vmul.f32 %v1018_v20, %v1018_v20 }
  0xe2   :  { %v486_v26 = vpop.f32.mrf.mxu0  ;;  %v1416_v2 = vpop.f32.mrf.mxu1 }
  0xe3   :  { %v835_v28 = vadd.f32 %v834_v25, %v772_v22  ;;  %v703_v29 = vadd.f32 %v1015_v8, %v702_v23  ;;  %v774_v33 = vmul.f32 %v486_v26, %v486_v26 }
  0xe4   :  { %v1019_v30 = vpop.f32.mrf.mxu0  ;;  %v1418_v17 = vpop.f32.mrf.mxu1 }
  0xe5   :  { %v704_v32 = vadd.f32 %v703_v29, %v486_v26  ;;  %v836_v34 = vadd.f32 %v835_v28, %v773_v27  ;;  %v777_v45 = vmul.f32 %v1019_v30, %v1019_v30 }
  0xe6   :  { %v489_v35 = vpop.f32.mrf.mxu0  ;;  %v1420_v28 = vpop.f32.mrf.mxu1 }
  0xe7   :  { %v837_v36 = vadd.f32 %v836_v34, %v774_v33  ;;  %v705_v37 = vadd.f32 %v704_v32, %v489_v35  ;;  %v775_v38 = vmul.f32 %v489_v35, %v489_v35 }
  0xe8   :  { %v1022_v39 = vpop.f32.mrf.mxu0 }
  0xe9   :  { %v706_v42 = vadd.f32 %v1018_v20, %v705_v37  ;;  %v838_v43 = vadd.f32 %v837_v36, %v775_v38  ;;  %v780_v56 = vmul.f32 %v1022_v39, %v1022_v39  ;;  %v1422_v38 = vpop.f32.mrf.mxu1 }
  0xea   :  { %v502_v44 = vpop.f32.mrf.mxu0 }
  0xeb   :  { %v839_v4 = vadd.f32 %v838_v43, %v776_v41  ;;  %v707_v46 = vadd.f32 %v1019_v30, %v706_v42  ;;  %v778_v50 = vmul.f32 %v502_v44, %v502_v44 }
  0xec   :  { %v1023_v47 = vpop.f32.mrf.mxu0 }
  0xed   :  { %v708_v49 = vadd.f32 %v707_v46, %v502_v44  ;;  %v840_v51 = vadd.f32 %v839_v4, %v777_v45  ;;  %v781_v61 = vmul.f32 %v1023_v47, %v1023_v47 }
  0xee   :  { %v505_v52 = vpop.f32.mrf.mxu0 }
  0xef   :  { %v841_v53 = vadd.f32 %v840_v51, %v778_v50  ;;  %v709_v54 = vadd.f32 %v708_v49, %v505_v52  ;;  %v779_v14 = vmul.f32 %v505_v52, %v505_v52 }
  0xf0   :  { %v1026_v15 = vpop.f32.mrf.mxu0 }
  0xf1   :  { %v710_v58 = vadd.f32 %v1022_v39, %v709_v54  ;;  %v842_v59 = vadd.f32 %v841_v53, %v779_v14  ;;  %v784_v18 = vmul.f32 %v1026_v15, %v1026_v15 }
  0xf2   :  { %v518_v60 = vpop.f32.mrf.mxu0 }
  0xf3   :  { %v843_v63 = vadd.f32 %v842_v59, %v780_v56  ;;  %v711_v0 = vadd.f32 %v1023_v47, %v710_v58  ;;  %v782_v6 = vmul.f32 %v518_v60, %v518_v60  ;;  %v617_v47 = vpop.f32.mrf.mxu1 }
  0xf4   :  { %v1027_v1 = vpop.f32.mrf.mxu0 }
  0xf5   :  { %v712_v5 = vadd.f32 %v711_v0, %v518_v60  ;;  %v844_v7 = vadd.f32 %v843_v63, %v781_v61  ;;  %v785_v23 = vmul.f32 %v1027_v1, %v1027_v1 }
  0xf6   :  { %v521_v8 = vpop.f32.mrf.mxu0 }
  0xf7   :  { %v845_v10 = vadd.f32 %v844_v7, %v782_v6  ;;  %v713_v11 = vadd.f32 %v712_v5, %v521_v8  ;;  %v783_v12 = vmul.f32 %v521_v8, %v521_v8  ;;  %v795_v8 = vmul.f32 %v1400_v3, %v1400_v3 }
  0xf8   :  { %v1030_v13 = vpop.f32.mrf.mxu0 }
  0xf9   :  { %v714_v19 = vadd.f32 %v1026_v15, %v713_v11  ;;  %v846_v20 = vadd.f32 %v845_v10, %v783_v12  ;;  %v788_v39 = vmul.f32 %v1030_v13, %v1030_v13  ;;  %v1424_v15 = vpop.f32.mrf.mxu1  ;;  %v796_v12 = vmul.f32 %v1394_v55, %v1394_v55 }
  0xfa   :  { %v534_v22 = vpop.f32.mrf.mxu0 }
  0xfb   :  { %v847_v25 = vadd.f32 %v846_v20, %v784_v18  ;;  %v715_v26 = vadd.f32 %v1027_v1, %v714_v19  ;;  %v786_v30 = vmul.f32 %v534_v22, %v534_v22  ;;  %v630_v0 = vpop.f32.mrf.mxu1  ;;  %v794_v1 = vmul.f32 %v1396_v57, %v1396_v57 }
  0xfc   :  { %v1031_v27 = vpop.f32.mrf.mxu0  ;;  %v797_v19 = vmul.f32 %v1398_v62, %v1398_v62 }
  0xfd   :  { %v716_v29 = vadd.f32 %v715_v26, %v534_v22  ;;  %v848_v32 = vadd.f32 %v847_v25, %v785_v23  ;;  %v789_v44 = vmul.f32 %v1031_v27, %v1031_v27  ;;  %v1055_v11 = vpop.f32.mrf.mxu1 }
  0xfe   :  { %v537_v33 = vpop.f32.mrf.mxu0 }
  0xff   :  { %v849_v34 = vadd.f32 %v848_v32, %v786_v30  ;;  %v717_v35 = vadd.f32 %v716_v29, %v537_v33  ;;  %v787_v36 = vmul.f32 %v537_v33, %v537_v33  ;;  %v800_v30 = vmul.f32 %v1402_v9, %v1402_v9 }
 0x100   :  { %v1034_v37 = vpop.f32.mrf.mxu0  ;;  %v801_v33 = vmul.f32 %v1406_v21, %v1406_v21 }
 0x101   :  { %v718_v41 = vadd.f32 %v1030_v13, %v717_v35  ;;  %v850_v42 = vadd.f32 %v849_v34, %v787_v36  ;;  %v792_v56 = vmul.f32 %v1034_v37, %v1034_v37 }
 0x102   :  { %v550_v43 = vpop.f32.mrf.mxu0 }
 0x103   :  { %v851_v45 = vadd.f32 %v850_v42, %v788_v39  ;;  %v719_v4 = vadd.f32 %v1031_v27, %v718_v41  ;;  %v790_v50 = vmul.f32 %v550_v43, %v550_v43 }
 0x104   :  { %v1035_v46 = vpop.f32.mrf.mxu0 }
 0x105   :  { %v720_v49 = vadd.f32 %v719_v4, %v550_v43  ;;  %v852_v51 = vadd.f32 %v851_v45, %v789_v44  ;;  %v793_v60 = vmul.f32 %v1035_v46, %v1035_v46  ;;  %v804_v43 = vmul.f32 %v1410_v40, %v1410_v40 }
 0x106   :  { %v553_v52 = vpop.f32.mrf.mxu0  ;;  %v805_v45 = vmul.f32 %v1414_v24, %v1414_v24 }
 0x107   :  { %v853_v53 = vadd.f32 %v852_v51, %v790_v50  ;;  %v721_v54 = vadd.f32 %v720_v49, %v553_v52  ;;  %v791_v14 = vmul.f32 %v553_v52, %v553_v52  ;;  %v806_v50 = vmul.f32 %v1420_v28, %v1420_v28 }
 0x109   :  { %v722_v58 = vadd.f32 %v1034_v37, %v721_v54  ;;  %v854_v59 = vadd.f32 %v853_v53, %v791_v14  ;;  %v802_v37 = vmul.f32 %v1412_v48, %v1412_v48  ;;  %v807_v53 = vmul.f32 %v617_v47, %v617_v47 }
 0x10b   :  { %v723_v61 = vadd.f32 %v1035_v46, %v722_v58  ;;  %v855_v63 = vadd.f32 %v854_v59, %v792_v56 }
 0x10d   :  { %v856_v5 = vadd.f32 %v855_v63, %v793_v60  ;;  %v724_v6 = vadd.f32 %v723_v61, %v1396_v57  ;;  %v633_v57 = vpop.f32.mrf.mxu1 }
 0x10f   :  { %v725_v7 = vadd.f32 %v724_v6, %v1400_v3  ;;  %v857_v10 = vadd.f32 %v856_v5, %v794_v1  ;;  %v798_v3 = vmul.f32 %v1404_v16, %v1404_v16  ;;  %v1058_v29 = vpop.f32.mrf.mxu1 }
 0x111   :  { %v726_v13 = vadd.f32 %v1394_v55, %v725_v7  ;;  %v858_v18 = vadd.f32 %v857_v10, %v795_v8  ;;  %v799_v55 = vmul.f32 %v1408_v31, %v1408_v31  ;;  %v646_v35 = vpop.f32.mrf.mxu1  ;;  %v812_v7 = vmul.f32 %v1424_v15, %v1424_v15 }
 0x112   :  { %v813_v10 = vmul.f32 %v1055_v11, %v1055_v11 }
 0x113   :  { %v859_v20 = vadd.f32 %v858_v18, %v796_v12  ;;  %v727_v22 = vadd.f32 %v1398_v62, %v726_v13  ;;  %v1059_v42 = vpop.f32.mrf.mxu1 }
 0x115   :  { %v728_v23 = vadd.f32 %v727_v22, %v1404_v16  ;;  %v860_v25 = vadd.f32 %v859_v20, %v797_v19  ;;  %v649_v46 = vpop.f32.mrf.mxu1 }
 0x117   :  { %v861_v26 = vadd.f32 %v860_v25, %v798_v3  ;;  %v729_v27 = vadd.f32 %v728_v23, %v1408_v31  ;;  %v1062_v54 = vpop.f32.mrf.mxu1  ;;  %v815_v23 = vmul.f32 %v649_v46, %v649_v46  ;;  %v816_v25 = vmul.f32 %v1058_v29, %v1058_v29 }
 0x119   :  { %v730_v32 = vadd.f32 %v1402_v9, %v729_v27  ;;  %v862_v62 = vadd.f32 %v861_v26, %v799_v55  ;;  %v803_v9 = vmul.f32 %v1416_v2, %v1416_v2  ;;  %v662_v60 = vpop.f32.mrf.mxu1  ;;  %v817_v27 = vmul.f32 %v1059_v42, %v1059_v42 }
 0x11b   :  { %v863_v34 = vadd.f32 %v862_v62, %v800_v30  ;;  %v731_v16 = vadd.f32 %v1406_v21, %v730_v32  ;;  %v1063_v6 = vpop.f32.mrf.mxu1  ;;  %v818_v62 = vmul.f32 %v662_v60, %v662_v60 }
 0x11d   :  { %v732_v36 = vadd.f32 %v731_v16, %v1412_v48  ;;  %v864_v31 = vadd.f32 %v863_v34, %v801_v33  ;;  %v665_v18 = vpop.f32.mrf.mxu1 }
 0x11e   :  { %v819_v16 = vmul.f32 %v665_v18, %v665_v18 }
 0x11f   :  { %v865_v39 = vadd.f32 %v864_v31, %v802_v37  ;;  %v733_v41 = vadd.f32 %v732_v36, %v1416_v2  ;;  %v1066_v3 = vpop.f32.mrf.mxu1 }
 0x121   :  { %v734_v44 = vadd.f32 %v1410_v40, %v733_v41  ;;  %v866_v21 = vadd.f32 %v865_v39, %v803_v9  ;;  %v808_v40 = vmul.f32 %v1418_v17, %v1418_v17  ;;  %v678_v32 = vpop.f32.mrf.mxu1  ;;  %v821_v39 = vmul.f32 %v1063_v6, %v1063_v6 }
 0x123   :  { %v867_v4 = vadd.f32 %v866_v21, %v804_v43  ;;  %v735_v48 = vadd.f32 %v1414_v24, %v734_v44  ;;  %v809_v24 = vmul.f32 %v1422_v38, %v1422_v38  ;;  %v1067_v36 = vpop.f32.mrf.mxu1  ;;  %v822_v44 = vmul.f32 %v678_v32, %v678_v32 }
 0x125   :  { %v736_v49 = vadd.f32 %v735_v48, %v1420_v28  ;;  %v868_v2 = vadd.f32 %v867_v4, %v805_v45  ;;  %v810_v28 = vmul.f32 %v630_v0, %v630_v0  ;;  %v681_v43 = vpop.f32.mrf.mxu1  ;;  %v824_v48 = vmul.f32 %v1066_v3, %v1066_v3 }
 0x126   :  { %v823_v4 = vmul.f32 %v681_v43, %v681_v43 }
 0x127   :  { %v869_v51 = vadd.f32 %v868_v2, %v806_v50  ;;  %v737_v52 = vadd.f32 %v736_v49, %v617_v47  ;;  %v811_v47 = vmul.f32 %v633_v57, %v633_v57  ;;  %v825_v50 = vmul.f32 %v1067_v36, %v1067_v36 }
 0x129   :  { %v738_v14 = vadd.f32 %v1418_v17, %v737_v52  ;;  %v870_v56 = vadd.f32 %v869_v51, %v807_v53 }
 0x12b   :  { %v871_v58 = vadd.f32 %v870_v56, %v808_v40  ;;  %v739_v59 = vadd.f32 %v1422_v38, %v738_v14  ;;  %v814_v38 = vmul.f32 %v646_v35, %v646_v35 }
 0x12d   :  { %v740_v61 = vadd.f32 %v739_v59, %v630_v0  ;;  %v872_v63 = vadd.f32 %v871_v58, %v809_v24 }
 0x12f   :  { %v873_v1 = vadd.f32 %v872_v63, %v810_v28  ;;  %v741_v5 = vadd.f32 %v740_v61, %v633_v57 }
 0x131   :  { %v742_v17 = vadd.f32 %v1424_v15, %v741_v5  ;;  %v874_v8 = vadd.f32 %v873_v1, %v811_v47 }
 0x133   :  { %v875_v12 = vadd.f32 %v874_v8, %v812_v7  ;;  %v743_v13 = vadd.f32 %v1055_v11, %v742_v17 }
 0x135   :  { %v744_v19 = vadd.f32 %v743_v13, %v646_v35  ;;  %v876_v20 = vadd.f32 %v875_v12, %v813_v10  ;;  %v820_v35 = vmul.f32 %v1062_v54, %v1062_v54 }
 0x137   :  { %v877_v22 = vadd.f32 %v876_v20, %v814_v38  ;;  %v745_v0 = vadd.f32 %v744_v19, %v649_v46 }
 0x139   :  { %v746_v57 = vadd.f32 %v1058_v29, %v745_v0  ;;  %v878_v26 = vadd.f32 %v877_v22, %v815_v23 }
 0x13b   :  { %v879_v55 = vadd.f32 %v878_v26, %v816_v25  ;;  %v747_v30 = vadd.f32 %v1059_v42, %v746_v57 }
 0x13d   :  { %v748_v15 = vadd.f32 %v747_v30, %v662_v60  ;;  %v880_v33 = vadd.f32 %v879_v55, %v817_v27 }
 0x13f   :  { %v881_v34 = vadd.f32 %v880_v33, %v818_v62  ;;  %v749_v11 = vadd.f32 %v748_v15, %v665_v18 }
 0x141   :  { %v750_v37 = vadd.f32 %v1062_v54, %v749_v11  ;;  %v882_v31 = vadd.f32 %v881_v34, %v819_v16 }
 0x143   :  { %v883_v41 = vadd.f32 %v882_v31, %v820_v35  ;;  %v751_v9 = vadd.f32 %v1063_v6, %v750_v37 }
 0x145   :  { %v752_v29 = vadd.f32 %v751_v9, %v678_v32  ;;  %v884_v21 = vadd.f32 %v883_v41, %v821_v39 }
 0x147   :  { %v885_v45 = vadd.f32 %v884_v21, %v822_v44  ;;  %v753_v42 = vadd.f32 %v752_v29, %v681_v43 }
 0x149   :  { %v754_v46 = vadd.f32 %v1066_v3, %v753_v42  ;;  %v886_v49 = vadd.f32 %v885_v45, %v823_v4 }
 0x14b   :  { %v755_v2 = vadd.f32 %v1067_v36, %v754_v46  ;;  %v887_v51 = vadd.f32 %v886_v49, %v824_v48 }
 0x14d   :  { %v756_v52 = vrot.slane %v755_v2, 4  ;;  %v888_v53 = vadd.f32 %v887_v51, %v825_v50 }
 0x14f   :  { %v757_v54 = vadd.f32 %v756_v52, %v755_v2  ;;  %v889_v40 = vrot.slane %v888_v53, 4 }
 0x151   :  { %v758_v14 = vrot.slane %v757_v54, 2  ;;  %v890_v56 = vadd.f32 %v889_v40, %v888_v53 }
 0x153   :  { %v759_v24 = vadd.f32 %v758_v14, %v757_v54  ;;  %v891_v58 = vrot.slane %v890_v56, 2 }
 0x155   :  { %v760_v59 = vrot.slane %v759_v24, 1  ;;  %v892_v60 = vadd.f32 %v891_v58, %v890_v56 }
 0x157   :  { %v761_v61 = vadd.f32 %v760_v59, %v759_v24  ;;  %v893_v28 = vrot.slane %v892_v60, 1 }
 0x159   :  { %v894_v63 = vadd.f32 %v893_v28, %v892_v60  ;;  %895 = vst [vmem:[%s1482_s2] sm:$0xff] %v761_v61 }
 0x15b   :  { %896 = vst [vmem:[%s1483_s3] sm:$0xff] %v894_v63 }

</bundles_post_ra>
